<compile_context>
chip_gen: v5e
topology: v5e:2x2
jax: 0.10.0
libtpu: 0.0.40
codegen_flags: <defaults>
</compile_context>

<pallas_src>
import functools

import jax
import jax.numpy as jnp
import numpy as np
from jax.experimental import pallas as pl
from jax.experimental.pallas import tpu as pltpu

# MXU operand dtype for the coupling-net matmuls (v6e/v7x fast path).  Set to
# jnp.float32 to recover <2e-3 agreement with the reference; the test tolerance
# below is sized for bf16 operands (f32 accumulation is kept either way).
MATMUL_DTYPE = jnp.bfloat16


# ----------------------------------------------------------------------------
# Fused GlowStep kernel.  One grid step == one group of `bg` images, laid out
# channels-major with batch folded into the lane dimension: (C, bg*H*W).
# ----------------------------------------------------------------------------
def _glow_step_kernel(x_ref, cond_ref, wf_ref, bf_ref,
                      w1p_ref, b1_ref, w2_ref, b2_ref, w3_ref, b3_ref,
                      out_ref, ld_ref, *, H, W, bg):
    C = x_ref.shape[0]
    Ch = C // 2
    lanes = x_ref.shape[1]            # bg * H * W
    HW = H * W
    mm_dtype = w1p_ref.dtype

    # ---- boundary masks: built once, shared by all 18 conv taps ------------
    lane = jax.lax.broadcasted_iota(jnp.int32, (1, lanes), 1)
    pos = lane % HW                   # flat position inside its own image
    col = lane % W
    m_up = pos >= W                   # source row y-1 exists  (tap dy = -1)
    m_dn = pos < HW - W               # source row y+1 exists  (tap dy = +1)
    m_lf = col >= 1                   # source col x-1 exists  (tap dx = -1)
    m_rt = col < W - 1                # source col x+1 exists  (tap dx = +1)

    def tap_mask(dy, dx):
        m = None
        for mm, use in ((m_up, dy == -1), (m_dn, dy == 1),
                        (m_lf, dx == -1), (m_rt, dx == 1)):
            if use:
                m = mm if m is None else jnp.logical_and(m, mm)
        return m                      # None for the centre tap

    taps = [(ky - 1, kx - 1) for ky in range(3) for kx in range(3)]
    masks = [tap_mask(dy, dx) for (dy, dx) in taps]

    def lane_shift(a, dy, dx):
        # b[:, l] = a[:, l + dy*W + dx]   (circular; out-of-image / cross-image
        # lanes are zeroed by the per-tap masks above)
        s = dy * W + dx
        if s == 0:
            return a
        return pltpu.roll(a, shift=(-s) % lanes, axis=1)

    # ---- ActNorm + InvConv1x1 folded into one affine map:  y = Wf @ x + bf --
    # (kept in f32: xa passes straight through to the output)
    y = jnp.dot(wf_ref[...], x_ref[...],
                preferred_element_type=jnp.float32) + bf_ref[...]
    xa = y[:Ch]                                                  # (Ch, lanes)
    xb = y[Ch:]                                                  # (Ch, lanes)

    # ---- coupling net: conv3x3 -> relu -> conv1x1 -> relu -> conv3x3 --------
    # conv1: im2col along the contraction dim -> a single (hidden, 9*Cin1) matmul
    hin = jnp.concatenate([xa, cond_ref[...]], axis=0)           # (Cin1, lanes)
    pieces = []
    for (dy, dx), m in zip(taps, masks):
        p = lane_shift(hin, dy, dx)
        if m is not None:
            p = jnp.where(m, p, 0.0)
        pieces.append(p)
    patches = jnp.concatenate(pieces, axis=0).astype(mm_dtype)   # (9*Cin1, lanes)
    h1 = jnp.maximum(
        jnp.dot(w1p_ref[...], patches, preferred_element_type=jnp.float32)
        + b1_ref[...], 0.0)

    # conv2: 1x1
    h2 = jnp.maximum(
        jnp.dot(w2_ref[...], h1.astype(mm_dtype),
                preferred_element_type=jnp.float32) + b2_ref[...], 0.0)

    # conv3: matmul first, then roll/mask the small (C, lanes) partials.
    # (w3[k] @ (mask * roll(h2)) == mask * roll(w3[k] @ h2): per-lane masks and
    #  lane permutations commute with the channel contraction.)
    h2m = h2.astype(mm_dtype)
    acc3 = jnp.zeros((C, lanes), jnp.float32)
    for k, ((dy, dx), m) in enumerate(zip(taps, masks)):
        part = jnp.dot(w3_ref[k], h2m, preferred_element_type=jnp.float32)
        part = lane_shift(part, dy, dx)
        if m is not None:
            part = jnp.where(m, part, 0.0)
        acc3 = acc3 + part
    net = acc3 + b3_ref[...]

    log_s = net[:Ch]
    t = net[Ch:]
    s = jax.nn.sigmoid(log_s + 2.0)
    yb = (xb + t) * s

    # write the two output halves directly (no concatenate temp)
    out_ref[:Ch, :] = xa
    out_ref[Ch:, :] = yb

    # per-image coupling log-determinant (one scalar per image in the group)
    logs = jnp.log(s)                                            # (Ch, lanes) f32
    ld_parts = [jnp.sum(logs[:, bi * HW:(bi + 1) * HW], keepdims=True)
                for bi in range(bg)]
    ld_ref[0] = ld_parts[0] if bg == 1 else jnp.concatenate(ld_parts, axis=1)


def _batch_per_step(B):
    # keep >=2 grid steps for v7x megacore, cap lanes/step to bound VMEM.
    if B <= 1:
        return 1
    for bg in (8, 4, 2):
        if B % bg == 0 and B // bg >= 2:
            return bg
    return 1


def glow_step_pallas(x_cm, cond_cm, prep, *, H, W, B):
    C, _ = x_cm.shape
    Cc = cond_cm.shape[0]
    HW = H * W
    bg = _batch_per_step(B)
    G = B // bg
    lanes = bg * HW
    hidden = prep["w2t"].shape[0]
    K1 = prep["w1p"].shape[1]

    kernel = functools.partial(_glow_step_kernel, H=H, W=W, bg=bg)
    # Per-step VMEM at these shapes is well under every generation's limit.
    # TODO(synk): at production sizes (hidden~512, 64x64 images) re-derive the
    # budget for v7x's 64 MiB VMEM and tile HW with halo-aware shifts.
    out, ld = pl.pallas_call(
        kernel,
        out_shape=(jax.ShapeDtypeStruct((C, B * HW), jnp.float32),
                   jax.ShapeDtypeStruct((G, 1, bg), jnp.float32)),
        grid=(G,),
        in_specs=[
            pl.BlockSpec((C, lanes), lambda g: (0, g)),
            pl.BlockSpec((Cc, lanes), lambda g: (0, g)),
            pl.BlockSpec((C, C), lambda g: (0, 0)),
            pl.BlockSpec((C, 1), lambda g: (0, 0)),
            pl.BlockSpec((hidden, K1), lambda g: (0, 0)),
            pl.BlockSpec((hidden, 1), lambda g: (0, 0)),
            pl.BlockSpec((hidden, hidden), lambda g: (0, 0)),
            pl.BlockSpec((hidden, 1), lambda g: (0, 0)),
            pl.BlockSpec((9, C, hidden), lambda g: (0, 0, 0)),
            pl.BlockSpec((C, 1), lambda g: (0, 0)),
        ],
        out_specs=[
            pl.BlockSpec((C, lanes), lambda g: (0, g)),
            pl.BlockSpec((1, 1, bg), lambda g: (g, 0, 0)),
        ],
        compiler_params=pltpu.CompilerParams(dimension_semantics=("parallel",)),
    )(x_cm, cond_cm, prep["wf"], prep["bf"], prep["w1p"], prep["b1"],
      prep["w2t"], prep["b2"], prep["w3t"], prep["b3"])
    return out, ld.reshape(B)


# ----------------------------------------------------------------------------
# Parameter prep: done ONCE (outside the per-step jit), not per forward call.
# ----------------------------------------------------------------------------
def prepare_glow_step_params(params, H, W):
    scale = params["an_scale"].astype(jnp.float32)
    loc = params["an_loc"].astype(jnp.float32)
    inv_w = params["inv_w"].astype(jnp.float32)
    C = inv_w.shape[0]
    Cin1 = params["w1"].shape[2]
    hidden = params["w1"].shape[3]

    # fold ActNorm into the 1x1 invertible conv:  y = inv_w @ (scale*(x+loc)) = Wf@x + bf
    wf = inv_w * scale[None, :]
    bf = (inv_w @ (scale * loc)).reshape(C, 1)

    # coupling-net weights, kernel-ready (channels-major matmul layouts)
    w1p = params["w1"].reshape(9 * Cin1, hidden).T.astype(MATMUL_DTYPE)   # (hidden, 9*Cin1)
    w2t = params["w2"].T.astype(MATMUL_DTYPE)                             # (hidden, hidden)
    w3t = jnp.transpose(params["w3"], (0, 1, 3, 2)).reshape(9, C, hidden).astype(MATMUL_DTYPE)

    # parameter-only log-determinant terms (identical for every batch element)
    param_logdet = (H * W) * (jnp.sum(jnp.log(jnp.abs(scale)))
                              + jnp.linalg.slogdet(inv_w)[1])

    return {
        "wf": wf.astype(jnp.float32),
        "bf": bf.astype(jnp.float32),
        "w1p": w1p, "b1": params["b1"].reshape(hidden, 1).astype(jnp.float32),
        "w2t": w2t, "b2": params["b2"].reshape(hidden, 1).astype(jnp.float32),
        "w3t": w3t, "b3": params["b3"].reshape(C, 1).astype(jnp.float32),
        "param_logdet": param_logdet.astype(jnp.float32),
    }


# ----------------------------------------------------------------------------
# GlowStep forward (reverse=False): actnorm -> invconv -> affine coupling
# ----------------------------------------------------------------------------
@jax.jit
def glow_step_forward(prep, x_nchw, cond_nchw, logdet):
    B, C, H, W = x_nchw.shape
    Cc = cond_nchw.shape[1]
    HW = H * W

    # channels-major with batch folded into lanes: (C, B*HW)
    x_cm = jnp.transpose(x_nchw.astype(jnp.float32).reshape(B, C, HW),
                         (1, 0, 2)).reshape(C, B * HW)
    cond_cm = jnp.transpose(cond_nchw.astype(jnp.float32).reshape(B, Cc, HW),
                            (1, 0, 2)).reshape(Cc, B * HW)

    out_cm, ld_c = glow_step_pallas(x_cm, cond_cm, prep, H=H, W=W, B=B)

    out = jnp.transpose(out_cm.reshape(C, B, HW), (1, 0, 2)).reshape(B, C, H, W)
    logdet = logdet + prep["param_logdet"] + ld_c
    return out, logdet


# ----------------------------------------------------------------------------
# Pure-JAX reference (for correctness check)
# ----------------------------------------------------------------------------
def ref_forward(params, x_nchw, cond_nchw, logdet):
    B, C, H, W = x_nchw.shape
    x = jnp.transpose(x_nchw, (0, 2, 3, 1)).astype(jnp.float32)
    cond = jnp.transpose(cond_nchw, (0, 2, 3, 1)).astype(jnp.float32)

    y = params["an_scale"].reshape(1, 1, 1, C) * (x + params["an_loc"].reshape(1, 1, 1, C))
    y = jnp.einsum("bhwc,oc->bhwo", y, params["inv_w"])
    logdet = logdet + H * W * jnp.sum(jnp.log(jnp.abs(params["an_scale"])))
    logdet = logdet + H * W * jnp.linalg.slogdet(params["inv_w"])[1]

    Ch = C // 2
    xa, xb = y[..., :Ch], y[..., Ch:]
    hin = jnp.concatenate([xa, cond], axis=-1)

    def conv3x3(v, w, b):
        o = jax.lax.conv_general_dilated(v, w, (1, 1), "SAME",
                                         dimension_numbers=("NHWC", "HWIO", "NHWC"))
        return o + b.reshape(1, 1, 1, -1)

    h1 = jax.nn.relu(conv3x3(hin, params["w1"], params["b1"]))
    h2 = jax.nn.relu(jnp.einsum("bhwc,cf->bhwf", h1, params["w2"])
                     + params["b2"].reshape(1, 1, 1, -1))
    net = conv3x3(h2, params["w3"], params["b3"])
    log_s, t = net[..., :Ch], net[..., Ch:]
    s = jax.nn.sigmoid(log_s + 2.0)
    yb = (xb + t) * s
    logdet = logdet + jnp.sum(jnp.log(s), axis=(1, 2, 3))
    out = jnp.concatenate([xa, yb], axis=-1)
    return jnp.transpose(out, (0, 3, 1, 2)), logdet


if __name__ == "__main__":
    B, C, H, W = 2, 4, 16, 16           # x_size (NCHW)
    Cc = 4                              # condition channels (same spatial size)
    hidden = 32                         # args.n_units_affine

    key = jax.random.PRNGKey(0)
    ks = jax.random.split(key, 10)
    x = jax.random.normal(ks[0], (B, C, H, W), jnp.float32)
    cond = jax.random.normal(ks[1], (B, Cc, H, W), jnp.float32)
    logdet0 = jnp.zeros((B,), jnp.float32)

    Ch = C // 2
    Cin1 = Ch + Cc
    params = {
        # ActNorm
        "an_loc": 0.1 * jax.random.normal(ks[2], (C,), jnp.float32),
        "an_scale": 1.0 + 0.1 * jax.random.normal(ks[3], (C,), jnp.float32),
        # InvConv 1x1 (orthogonal init, as in Glow)
        "inv_w": jnp.linalg.qr(jax.random.normal(ks[4], (C, C), jnp.float32))[0],
        # Coupling net: conv3x3 -> relu -> conv1x1 -> relu -> conv3x3 (-> log_s, t)
        "w1": 0.1 * jax.random.normal(ks[5], (3, 3, Cin1, hidden), jnp.float32),
        "b1": jnp.zeros((hidden,), jnp.float32),
        "w2": 0.1 * jax.random.normal(ks[6], (hidden, hidden), jnp.float32),
        "b2": jnp.zeros((hidden,), jnp.float32),
        # last conv of the coupling net is a ZeroConv in Glow; small random init
        # so the affine path is exercised non-trivially.
        "w3": 0.05 * jax.random.normal(ks[7], (3, 3, hidden, C), jnp.float32),
        "b3": jnp.zeros((C,), jnp.float32),
    }

    prep = prepare_glow_step_params(params, H, W)   # one-time parameter prep

    out, logdet = glow_step_forward(prep, x, cond, logdet0)
    out = jax.block_until_ready(out)
    logdet = jax.block_until_ready(logdet)

    ref_out, ref_ld = ref_forward(params, x, cond, logdet0)
    # Tolerance sized for bf16 MXU operands (set MATMUL_DTYPE = jnp.float32 for <2e-3).
    np.testing.assert_allclose(np.asarray(out), np.asarray(ref_out), rtol=1e-2, atol=1e-2)
    np.testing.assert_allclose(np.asarray(logdet), np.asarray(ref_ld), rtol=1e-2, atol=1e-2)

    print("KERNEL_OK")
</pallas_src>

<mosaic_0001>
module attributes {stable_mosaic.version = 11 : i64} {
  func.func @_glow_step_kernel(%arg0: i32, %arg1: memref<4x256xf32, #tpu.memory_space<vmem>>, %arg2: memref<4x256xf32, #tpu.memory_space<vmem>>, %arg3: memref<4x4xf32, #tpu.memory_space<vmem>>, %arg4: memref<4x1xf32, #tpu.memory_space<vmem>>, %arg5: memref<32x54xbf16, #tpu.memory_space<vmem>>, %arg6: memref<32x1xf32, #tpu.memory_space<vmem>>, %arg7: memref<32x32xbf16, #tpu.memory_space<vmem>>, %arg8: memref<32x1xf32, #tpu.memory_space<vmem>>, %arg9: memref<9x4x32xbf16, #tpu.memory_space<vmem>>, %arg10: memref<4x1xf32, #tpu.memory_space<vmem>>, %arg11: memref<4x256xf32, #tpu.memory_space<vmem>>, %arg12: memref<1x1x1xf32, #tpu.memory_space<vmem>>) attributes {dimension_semantics = [#tpu.dimension_semantics<parallel>], iteration_bounds = array<i64: 2>, scalar_prefetch = 0 : i64, scratch_operands = 0 : i64, tpu.core_type = #tpu.core_type<tc>, window_params = [{transform_indices = @transform_0, window_bounds = array<i64: 4, 256>}, {transform_indices = @transform_1, window_bounds = array<i64: 4, 256>}, {pipeline_mode = #tpu.pipeline_mode<synchronous>, transform_indices = @transform_2, window_bounds = array<i64: 4, 4>}, {pipeline_mode = #tpu.pipeline_mode<synchronous>, transform_indices = @transform_3, window_bounds = array<i64: 4, 1>}, {pipeline_mode = #tpu.pipeline_mode<synchronous>, transform_indices = @transform_4, window_bounds = array<i64: 32, 54>}, {pipeline_mode = #tpu.pipeline_mode<synchronous>, transform_indices = @transform_5, window_bounds = array<i64: 32, 1>}, {pipeline_mode = #tpu.pipeline_mode<synchronous>, transform_indices = @transform_6, window_bounds = array<i64: 32, 32>}, {pipeline_mode = #tpu.pipeline_mode<synchronous>, transform_indices = @transform_7, window_bounds = array<i64: 32, 1>}, {pipeline_mode = #tpu.pipeline_mode<synchronous>, transform_indices = @transform_8, window_bounds = array<i64: 9, 4, 32>}, {pipeline_mode = #tpu.pipeline_mode<synchronous>, transform_indices = @transform_9, window_bounds = array<i64: 4, 1>}, {transform_indices = @transform_10, window_bounds = array<i64: 4, 256>}, {transform_indices = @transform_11, window_bounds = array<i64: 1, 1, 1>}]} {
    %0 = tpu.iota {dimensions = array<i32: 1>} : vector<1x256xi32>
    %c256_i32 = arith.constant 256 : i32
    %c0_i32 = arith.constant 0 : i32
    %1 = arith.cmpi eq, %c256_i32, %c0_i32 : i32
    %c1_i32 = arith.constant 1 : i32
    %2 = arith.select %1, %c1_i32, %c256_i32 : i32
    %3 = vector.broadcast %2 : i32 to vector<1x256xi32>
    %4 = arith.remsi %0, %3 : vector<1x256xi32>
    %c0_i32_0 = arith.constant 0 : i32
    %5 = vector.broadcast %c0_i32_0 : i32 to vector<1x256xi32>
    %6 = arith.cmpi ne, %4, %5 : vector<1x256xi32>
    %c0_i32_1 = arith.constant 0 : i32
    %7 = vector.broadcast %c0_i32_1 : i32 to vector<1x256xi32>
    %8 = arith.cmpi slt, %4, %7 : vector<1x256xi32>
    %c0_i32_2 = arith.constant 0 : i32
    %9 = arith.cmpi slt, %2, %c0_i32_2 : i32
    %10 = vector.broadcast %9 : i1 to vector<1x256xi1>
    %11 = vector.broadcast %10 : vector<1x256xi1> to vector<1x256xi1>
    %12 = arith.xori %8, %11 : vector<1x256xi1>
    %13 = arith.andi %12, %6 : vector<1x256xi1>
    %14 = vector.broadcast %2 : i32 to vector<1x256xi32>
    %15 = arith.addi %4, %14 : vector<1x256xi32>
    %16 = arith.select %13, %15, %4 : vector<1x256xi1>, vector<1x256xi32>
    %c16_i32 = arith.constant 16 : i32
    %c0_i32_3 = arith.constant 0 : i32
    %17 = arith.cmpi eq, %c16_i32, %c0_i32_3 : i32
    %c1_i32_4 = arith.constant 1 : i32
    %18 = arith.select %17, %c1_i32_4, %c16_i32 : i32
    %19 = vector.broadcast %18 : i32 to vector<1x256xi32>
    %20 = arith.remsi %0, %19 : vector<1x256xi32>
    %c0_i32_5 = arith.constant 0 : i32
    %21 = vector.broadcast %c0_i32_5 : i32 to vector<1x256xi32>
    %22 = arith.cmpi ne, %20, %21 : vector<1x256xi32>
    %c0_i32_6 = arith.constant 0 : i32
    %23 = vector.broadcast %c0_i32_6 : i32 to vector<1x256xi32>
    %24 = arith.cmpi slt, %20, %23 : vector<1x256xi32>
    %c0_i32_7 = arith.constant 0 : i32
    %25 = arith.cmpi slt, %18, %c0_i32_7 : i32
    %26 = vector.broadcast %25 : i1 to vector<1x256xi1>
    %27 = vector.broadcast %26 : vector<1x256xi1> to vector<1x256xi1>
    %28 = arith.xori %24, %27 : vector<1x256xi1>
    %29 = arith.andi %28, %22 : vector<1x256xi1>
    %30 = vector.broadcast %18 : i32 to vector<1x256xi32>
    %31 = arith.addi %20, %30 : vector<1x256xi32>
    %32 = arith.select %29, %31, %20 : vector<1x256xi1>, vector<1x256xi32>
    %c16_i32_8 = arith.constant 16 : i32
    %33 = vector.broadcast %c16_i32_8 : i32 to vector<1x256xi32>
    %34 = arith.cmpi sge, %16, %33 : vector<1x256xi32>
    %c240_i32 = arith.constant 240 : i32
    %35 = vector.broadcast %c240_i32 : i32 to vector<1x256xi32>
    %36 = arith.cmpi slt, %16, %35 : vector<1x256xi32>
    %c1_i32_9 = arith.constant 1 : i32
    %37 = vector.broadcast %c1_i32_9 : i32 to vector<1x256xi32>
    %38 = arith.cmpi sge, %32, %37 : vector<1x256xi32>
    %c15_i32 = arith.constant 15 : i32
    %39 = vector.broadcast %c15_i32 : i32 to vector<1x256xi32>
    %40 = arith.cmpi slt, %32, %39 : vector<1x256xi32>
    %41 = arith.andi %34, %38 : vector<1x256xi1>
    %42 = arith.andi %34, %40 : vector<1x256xi1>
    %43 = arith.andi %36, %38 : vector<1x256xi1>
    %44 = arith.andi %36, %40 : vector<1x256xi1>
    %c0 = arith.constant 0 : index
    %c0_10 = arith.constant 0 : index
    %45 = vector.load %arg3[%c0, %c0_10] : memref<4x4xf32, #tpu.memory_space<vmem>>, vector<4x4xf32>
    %c0_11 = arith.constant 0 : index
    %c0_12 = arith.constant 0 : index
    %46 = vector.load %arg1[%c0_11, %c0_12] : memref<4x256xf32, #tpu.memory_space<vmem>>, vector<4x256xf32>
    %cst = arith.constant dense<0.000000e+00> : vector<4x256xf32>
    %47 = tpu.matmul %45, %46, %cst {dimension_numbers = #tpu.dot_dimension_numbers<[1], [0], [0], [1], [0, 0, 1, 1], [], []>} : vector<4x4xf32>, vector<4x256xf32>, vector<4x256xf32> -> vector<4x256xf32>
    %c0_13 = arith.constant 0 : index
    %c0_14 = arith.constant 0 : index
    %48 = vector.load %arg4[%c0_13, %c0_14] : memref<4x1xf32, #tpu.memory_space<vmem>>, vector<4x1xf32>
    %49 = vector.broadcast %48 : vector<4x1xf32> to vector<4x256xf32>
    %50 = arith.addf %47, %49 : vector<4x256xf32>
    %51 = vector.extract_strided_slice %50 {offsets = [0, 0], sizes = [2, 256], strides = [1, 1]} : vector<4x256xf32> to vector<2x256xf32>
    %52 = vector.extract_strided_slice %50 {offsets = [2, 0], sizes = [2, 256], strides = [1, 1]} : vector<4x256xf32> to vector<2x256xf32>
    %c0_15 = arith.constant 0 : index
    %c0_16 = arith.constant 0 : index
    %53 = vector.load %arg2[%c0_15, %c0_16] : memref<4x256xf32, #tpu.memory_space<vmem>>, vector<4x256xf32>
    %54 = tpu.concatenate %51, %53 in 0 : vector<2x256xf32>, vector<4x256xf32> -> vector<6x256xf32>
    %c17_i32 = arith.constant 17 : i32
    %55 = tpu.dynamic_rotate %54 by %c17_i32 dim 1 : vector<6x256xf32>, i32 -> vector<6x256xf32>
    %cst_17 = arith.constant 0.000000e+00 : f32
    %56 = vector.shape_cast %41 : vector<1x256xi1> to vector<1x256xi1>
    %57 = vector.broadcast %56 : vector<1x256xi1> to vector<6x256xi1>
    %58 = vector.broadcast %cst_17 : f32 to vector<6x256xf32>
    %59 = arith.select %57, %55, %58 : vector<6x256xi1>, vector<6x256xf32>
    %c16_i32_18 = arith.constant 16 : i32
    %60 = tpu.dynamic_rotate %54 by %c16_i32_18 dim 1 : vector<6x256xf32>, i32 -> vector<6x256xf32>
    %cst_19 = arith.constant 0.000000e+00 : f32
    %61 = vector.shape_cast %34 : vector<1x256xi1> to vector<1x256xi1>
    %62 = vector.broadcast %61 : vector<1x256xi1> to vector<6x256xi1>
    %63 = vector.broadcast %cst_19 : f32 to vector<6x256xf32>
    %64 = arith.select %62, %60, %63 : vector<6x256xi1>, vector<6x256xf32>
    %c15_i32_20 = arith.constant 15 : i32
    %65 = tpu.dynamic_rotate %54 by %c15_i32_20 dim 1 : vector<6x256xf32>, i32 -> vector<6x256xf32>
    %cst_21 = arith.constant 0.000000e+00 : f32
    %66 = vector.shape_cast %42 : vector<1x256xi1> to vector<1x256xi1>
    %67 = vector.broadcast %66 : vector<1x256xi1> to vector<6x256xi1>
    %68 = vector.broadcast %cst_21 : f32 to vector<6x256xf32>
    %69 = arith.select %67, %65, %68 : vector<6x256xi1>, vector<6x256xf32>
    %c1_i32_22 = arith.constant 1 : i32
    %70 = tpu.dynamic_rotate %54 by %c1_i32_22 dim 1 : vector<6x256xf32>, i32 -> vector<6x256xf32>
    %cst_23 = arith.constant 0.000000e+00 : f32
    %71 = vector.shape_cast %38 : vector<1x256xi1> to vector<1x256xi1>
    %72 = vector.broadcast %71 : vector<1x256xi1> to vector<6x256xi1>
    %73 = vector.broadcast %cst_23 : f32 to vector<6x256xf32>
    %74 = arith.select %72, %70, %73 : vector<6x256xi1>, vector<6x256xf32>
    %c255_i32 = arith.constant 255 : i32
    %75 = tpu.dynamic_rotate %54 by %c255_i32 dim 1 : vector<6x256xf32>, i32 -> vector<6x256xf32>
    %cst_24 = arith.constant 0.000000e+00 : f32
    %76 = vector.shape_cast %40 : vector<1x256xi1> to vector<1x256xi1>
    %77 = vector.broadcast %76 : vector<1x256xi1> to vector<6x256xi1>
    %78 = vector.broadcast %cst_24 : f32 to vector<6x256xf32>
    %79 = arith.select %77, %75, %78 : vector<6x256xi1>, vector<6x256xf32>
    %c241_i32 = arith.constant 241 : i32
    %80 = tpu.dynamic_rotate %54 by %c241_i32 dim 1 : vector<6x256xf32>, i32 -> vector<6x256xf32>
    %cst_25 = arith.constant 0.000000e+00 : f32
    %81 = vector.shape_cast %43 : vector<1x256xi1> to vector<1x256xi1>
    %82 = vector.broadcast %81 : vector<1x256xi1> to vector<6x256xi1>
    %83 = vector.broadcast %cst_25 : f32 to vector<6x256xf32>
    %84 = arith.select %82, %80, %83 : vector<6x256xi1>, vector<6x256xf32>
    %c240_i32_26 = arith.constant 240 : i32
    %85 = tpu.dynamic_rotate %54 by %c240_i32_26 dim 1 : vector<6x256xf32>, i32 -> vector<6x256xf32>
    %cst_27 = arith.constant 0.000000e+00 : f32
    %86 = vector.shape_cast %36 : vector<1x256xi1> to vector<1x256xi1>
    %87 = vector.broadcast %86 : vector<1x256xi1> to vector<6x256xi1>
    %88 = vector.broadcast %cst_27 : f32 to vector<6x256xf32>
    %89 = arith.select %87, %85, %88 : vector<6x256xi1>, vector<6x256xf32>
    %c239_i32 = arith.constant 239 : i32
    %90 = tpu.dynamic_rotate %54 by %c239_i32 dim 1 : vector<6x256xf32>, i32 -> vector<6x256xf32>
    %cst_28 = arith.constant 0.000000e+00 : f32
    %91 = vector.shape_cast %44 : vector<1x256xi1> to vector<1x256xi1>
    %92 = vector.broadcast %91 : vector<1x256xi1> to vector<6x256xi1>
    %93 = vector.broadcast %cst_28 : f32 to vector<6x256xf32>
    %94 = arith.select %92, %90, %93 : vector<6x256xi1>, vector<6x256xf32>
    %95 = tpu.concatenate %59, %64, %69, %74, %54, %79, %84, %89, %94 in 0 : vector<6x256xf32>, vector<6x256xf32>, vector<6x256xf32>, vector<6x256xf32>, vector<6x256xf32>, vector<6x256xf32>, vector<6x256xf32>, vector<6x256xf32>, vector<6x256xf32> -> vector<54x256xf32>
    %96 = arith.truncf %95 : vector<54x256xf32> to vector<54x256xbf16>
    %c0_29 = arith.constant 0 : index
    %c0_30 = arith.constant 0 : index
    %97 = vector.load %arg5[%c0_29, %c0_30] : memref<32x54xbf16, #tpu.memory_space<vmem>>, vector<32x54xbf16>
    %cst_31 = arith.constant dense<0.000000e+00> : vector<32x256xf32>
    %98 = tpu.matmul %97, %96, %cst_31 {dimension_numbers = #tpu.dot_dimension_numbers<[1], [0], [0], [1], [0, 0, 1, 1], [], []>} : vector<32x54xbf16>, vector<54x256xbf16>, vector<32x256xf32> -> vector<32x256xf32>
    %c0_32 = arith.constant 0 : index
    %c0_33 = arith.constant 0 : index
    %99 = vector.load %arg6[%c0_32, %c0_33] : memref<32x1xf32, #tpu.memory_space<vmem>>, vector<32x1xf32>
    %100 = vector.broadcast %99 : vector<32x1xf32> to vector<32x256xf32>
    %101 = arith.addf %98, %100 : vector<32x256xf32>
    %cst_34 = arith.constant 0.000000e+00 : f32
    %102 = vector.broadcast %cst_34 : f32 to vector<32x256xf32>
    %103 = arith.maximumf %101, %102 : vector<32x256xf32>
    %c0_35 = arith.constant 0 : index
    %c0_36 = arith.constant 0 : index
    %104 = vector.load %arg7[%c0_35, %c0_36] : memref<32x32xbf16, #tpu.memory_space<vmem>>, vector<32x32xbf16>
    %105 = arith.truncf %103 : vector<32x256xf32> to vector<32x256xbf16>
    %cst_37 = arith.constant dense<0.000000e+00> : vector<32x256xf32>
    %106 = tpu.matmul %104, %105, %cst_37 {dimension_numbers = #tpu.dot_dimension_numbers<[1], [0], [0], [1], [0, 0, 1, 1], [], []>} : vector<32x32xbf16>, vector<32x256xbf16>, vector<32x256xf32> -> vector<32x256xf32>
    %c0_38 = arith.constant 0 : index
    %c0_39 = arith.constant 0 : index
    %107 = vector.load %arg8[%c0_38, %c0_39] : memref<32x1xf32, #tpu.memory_space<vmem>>, vector<32x1xf32>
    %108 = vector.broadcast %107 : vector<32x1xf32> to vector<32x256xf32>
    %109 = arith.addf %106, %108 : vector<32x256xf32>
    %cst_40 = arith.constant 0.000000e+00 : f32
    %110 = vector.broadcast %cst_40 : f32 to vector<32x256xf32>
    %111 = arith.maximumf %109, %110 : vector<32x256xf32>
    %112 = arith.truncf %111 : vector<32x256xf32> to vector<32x256xbf16>
    %cst_41 = arith.constant 0.000000e+00 : f32
    %113 = vector.broadcast %cst_41 : f32 to vector<4x256xf32>
    %c0_42 = arith.constant 0 : index
    %c0_43 = arith.constant 0 : index
    %c0_44 = arith.constant 0 : index
    %114 = vector.load %arg9[%c0_42, %c0_43, %c0_44] : memref<9x4x32xbf16, #tpu.memory_space<vmem>>, vector<1x4x32xbf16>
    %115 = vector.shape_cast %114 : vector<1x4x32xbf16> to vector<4x32xbf16>
    %cst_45 = arith.constant dense<0.000000e+00> : vector<4x256xf32>
    %116 = tpu.matmul %115, %112, %cst_45 {dimension_numbers = #tpu.dot_dimension_numbers<[1], [0], [0], [1], [0, 0, 1, 1], [], []>} : vector<4x32xbf16>, vector<32x256xbf16>, vector<4x256xf32> -> vector<4x256xf32>
    %c17_i32_46 = arith.constant 17 : i32
    %117 = tpu.dynamic_rotate %116 by %c17_i32_46 dim 1 : vector<4x256xf32>, i32 -> vector<4x256xf32>
    %cst_47 = arith.constant 0.000000e+00 : f32
    %118 = vector.shape_cast %41 : vector<1x256xi1> to vector<1x256xi1>
    %119 = vector.broadcast %118 : vector<1x256xi1> to vector<4x256xi1>
    %120 = vector.broadcast %cst_47 : f32 to vector<4x256xf32>
    %121 = arith.select %119, %117, %120 : vector<4x256xi1>, vector<4x256xf32>
    %122 = arith.addf %113, %121 : vector<4x256xf32>
    %c1 = arith.constant 1 : index
    %c0_48 = arith.constant 0 : index
    %c0_49 = arith.constant 0 : index
    %123 = vector.load %arg9[%c1, %c0_48, %c0_49] : memref<9x4x32xbf16, #tpu.memory_space<vmem>>, vector<1x4x32xbf16>
    %124 = vector.shape_cast %123 : vector<1x4x32xbf16> to vector<4x32xbf16>
    %cst_50 = arith.constant dense<0.000000e+00> : vector<4x256xf32>
    %125 = tpu.matmul %124, %112, %cst_50 {dimension_numbers = #tpu.dot_dimension_numbers<[1], [0], [0], [1], [0, 0, 1, 1], [], []>} : vector<4x32xbf16>, vector<32x256xbf16>, vector<4x256xf32> -> vector<4x256xf32>
    %c16_i32_51 = arith.constant 16 : i32
    %126 = tpu.dynamic_rotate %125 by %c16_i32_51 dim 1 : vector<4x256xf32>, i32 -> vector<4x256xf32>
    %cst_52 = arith.constant 0.000000e+00 : f32
    %127 = vector.shape_cast %34 : vector<1x256xi1> to vector<1x256xi1>
    %128 = vector.broadcast %127 : vector<1x256xi1> to vector<4x256xi1>
    %129 = vector.broadcast %cst_52 : f32 to vector<4x256xf32>
    %130 = arith.select %128, %126, %129 : vector<4x256xi1>, vector<4x256xf32>
    %131 = arith.addf %122, %130 : vector<4x256xf32>
    %c2 = arith.constant 2 : index
    %c0_53 = arith.constant 0 : index
    %c0_54 = arith.constant 0 : index
    %132 = vector.load %arg9[%c2, %c0_53, %c0_54] : memref<9x4x32xbf16, #tpu.memory_space<vmem>>, vector<1x4x32xbf16>
    %133 = vector.shape_cast %132 : vector<1x4x32xbf16> to vector<4x32xbf16>
    %cst_55 = arith.constant dense<0.000000e+00> : vector<4x256xf32>
    %134 = tpu.matmul %133, %112, %cst_55 {dimension_numbers = #tpu.dot_dimension_numbers<[1], [0], [0], [1], [0, 0, 1, 1], [], []>} : vector<4x32xbf16>, vector<32x256xbf16>, vector<4x256xf32> -> vector<4x256xf32>
    %c15_i32_56 = arith.constant 15 : i32
    %135 = tpu.dynamic_rotate %134 by %c15_i32_56 dim 1 : vector<4x256xf32>, i32 -> vector<4x256xf32>
    %cst_57 = arith.constant 0.000000e+00 : f32
    %136 = vector.shape_cast %42 : vector<1x256xi1> to vector<1x256xi1>
    %137 = vector.broadcast %136 : vector<1x256xi1> to vector<4x256xi1>
    %138 = vector.broadcast %cst_57 : f32 to vector<4x256xf32>
    %139 = arith.select %137, %135, %138 : vector<4x256xi1>, vector<4x256xf32>
    %140 = arith.addf %131, %139 : vector<4x256xf32>
    %c3 = arith.constant 3 : index
    %c0_58 = arith.constant 0 : index
    %c0_59 = arith.constant 0 : index
    %141 = vector.load %arg9[%c3, %c0_58, %c0_59] : memref<9x4x32xbf16, #tpu.memory_space<vmem>>, vector<1x4x32xbf16>
    %142 = vector.shape_cast %141 : vector<1x4x32xbf16> to vector<4x32xbf16>
    %cst_60 = arith.constant dense<0.000000e+00> : vector<4x256xf32>
    %143 = tpu.matmul %142, %112, %cst_60 {dimension_numbers = #tpu.dot_dimension_numbers<[1], [0], [0], [1], [0, 0, 1, 1], [], []>} : vector<4x32xbf16>, vector<32x256xbf16>, vector<4x256xf32> -> vector<4x256xf32>
    %c1_i32_61 = arith.constant 1 : i32
    %144 = tpu.dynamic_rotate %143 by %c1_i32_61 dim 1 : vector<4x256xf32>, i32 -> vector<4x256xf32>
    %cst_62 = arith.constant 0.000000e+00 : f32
    %145 = vector.shape_cast %38 : vector<1x256xi1> to vector<1x256xi1>
    %146 = vector.broadcast %145 : vector<1x256xi1> to vector<4x256xi1>
    %147 = vector.broadcast %cst_62 : f32 to vector<4x256xf32>
    %148 = arith.select %146, %144, %147 : vector<4x256xi1>, vector<4x256xf32>
    %149 = arith.addf %140, %148 : vector<4x256xf32>
    %c4 = arith.constant 4 : index
    %c0_63 = arith.constant 0 : index
    %c0_64 = arith.constant 0 : index
    %150 = vector.load %arg9[%c4, %c0_63, %c0_64] : memref<9x4x32xbf16, #tpu.memory_space<vmem>>, vector<1x4x32xbf16>
    %151 = vector.shape_cast %150 : vector<1x4x32xbf16> to vector<4x32xbf16>
    %cst_65 = arith.constant dense<0.000000e+00> : vector<4x256xf32>
    %152 = tpu.matmul %151, %112, %cst_65 {dimension_numbers = #tpu.dot_dimension_numbers<[1], [0], [0], [1], [0, 0, 1, 1], [], []>} : vector<4x32xbf16>, vector<32x256xbf16>, vector<4x256xf32> -> vector<4x256xf32>
    %153 = arith.addf %149, %152 : vector<4x256xf32>
    %c5 = arith.constant 5 : index
    %c0_66 = arith.constant 0 : index
    %c0_67 = arith.constant 0 : index
    %154 = vector.load %arg9[%c5, %c0_66, %c0_67] : memref<9x4x32xbf16, #tpu.memory_space<vmem>>, vector<1x4x32xbf16>
    %155 = vector.shape_cast %154 : vector<1x4x32xbf16> to vector<4x32xbf16>
    %cst_68 = arith.constant dense<0.000000e+00> : vector<4x256xf32>
    %156 = tpu.matmul %155, %112, %cst_68 {dimension_numbers = #tpu.dot_dimension_numbers<[1], [0], [0], [1], [0, 0, 1, 1], [], []>} : vector<4x32xbf16>, vector<32x256xbf16>, vector<4x256xf32> -> vector<4x256xf32>
    %c255_i32_69 = arith.constant 255 : i32
    %157 = tpu.dynamic_rotate %156 by %c255_i32_69 dim 1 : vector<4x256xf32>, i32 -> vector<4x256xf32>
    %cst_70 = arith.constant 0.000000e+00 : f32
    %158 = vector.shape_cast %40 : vector<1x256xi1> to vector<1x256xi1>
    %159 = vector.broadcast %158 : vector<1x256xi1> to vector<4x256xi1>
    %160 = vector.broadcast %cst_70 : f32 to vector<4x256xf32>
    %161 = arith.select %159, %157, %160 : vector<4x256xi1>, vector<4x256xf32>
    %162 = arith.addf %153, %161 : vector<4x256xf32>
    %c6 = arith.constant 6 : index
    %c0_71 = arith.constant 0 : index
    %c0_72 = arith.constant 0 : index
    %163 = vector.load %arg9[%c6, %c0_71, %c0_72] : memref<9x4x32xbf16, #tpu.memory_space<vmem>>, vector<1x4x32xbf16>
    %164 = vector.shape_cast %163 : vector<1x4x32xbf16> to vector<4x32xbf16>
    %cst_73 = arith.constant dense<0.000000e+00> : vector<4x256xf32>
    %165 = tpu.matmul %164, %112, %cst_73 {dimension_numbers = #tpu.dot_dimension_numbers<[1], [0], [0], [1], [0, 0, 1, 1], [], []>} : vector<4x32xbf16>, vector<32x256xbf16>, vector<4x256xf32> -> vector<4x256xf32>
    %c241_i32_74 = arith.constant 241 : i32
    %166 = tpu.dynamic_rotate %165 by %c241_i32_74 dim 1 : vector<4x256xf32>, i32 -> vector<4x256xf32>
    %cst_75 = arith.constant 0.000000e+00 : f32
    %167 = vector.shape_cast %43 : vector<1x256xi1> to vector<1x256xi1>
    %168 = vector.broadcast %167 : vector<1x256xi1> to vector<4x256xi1>
    %169 = vector.broadcast %cst_75 : f32 to vector<4x256xf32>
    %170 = arith.select %168, %166, %169 : vector<4x256xi1>, vector<4x256xf32>
    %171 = arith.addf %162, %170 : vector<4x256xf32>
    %c7 = arith.constant 7 : index
    %c0_76 = arith.constant 0 : index
    %c0_77 = arith.constant 0 : index
    %172 = vector.load %arg9[%c7, %c0_76, %c0_77] : memref<9x4x32xbf16, #tpu.memory_space<vmem>>, vector<1x4x32xbf16>
    %173 = vector.shape_cast %172 : vector<1x4x32xbf16> to vector<4x32xbf16>
    %cst_78 = arith.constant dense<0.000000e+00> : vector<4x256xf32>
    %174 = tpu.matmul %173, %112, %cst_78 {dimension_numbers = #tpu.dot_dimension_numbers<[1], [0], [0], [1], [0, 0, 1, 1], [], []>} : vector<4x32xbf16>, vector<32x256xbf16>, vector<4x256xf32> -> vector<4x256xf32>
    %c240_i32_79 = arith.constant 240 : i32
    %175 = tpu.dynamic_rotate %174 by %c240_i32_79 dim 1 : vector<4x256xf32>, i32 -> vector<4x256xf32>
    %cst_80 = arith.constant 0.000000e+00 : f32
    %176 = vector.shape_cast %36 : vector<1x256xi1> to vector<1x256xi1>
    %177 = vector.broadcast %176 : vector<1x256xi1> to vector<4x256xi1>
    %178 = vector.broadcast %cst_80 : f32 to vector<4x256xf32>
    %179 = arith.select %177, %175, %178 : vector<4x256xi1>, vector<4x256xf32>
    %180 = arith.addf %171, %179 : vector<4x256xf32>
    %c8 = arith.constant 8 : index
    %c0_81 = arith.constant 0 : index
    %c0_82 = arith.constant 0 : index
    %181 = vector.load %arg9[%c8, %c0_81, %c0_82] : memref<9x4x32xbf16, #tpu.memory_space<vmem>>, vector<1x4x32xbf16>
    %182 = vector.shape_cast %181 : vector<1x4x32xbf16> to vector<4x32xbf16>
    %cst_83 = arith.constant dense<0.000000e+00> : vector<4x256xf32>
    %183 = tpu.matmul %182, %112, %cst_83 {dimension_numbers = #tpu.dot_dimension_numbers<[1], [0], [0], [1], [0, 0, 1, 1], [], []>} : vector<4x32xbf16>, vector<32x256xbf16>, vector<4x256xf32> -> vector<4x256xf32>
    %c239_i32_84 = arith.constant 239 : i32
    %184 = tpu.dynamic_rotate %183 by %c239_i32_84 dim 1 : vector<4x256xf32>, i32 -> vector<4x256xf32>
    %cst_85 = arith.constant 0.000000e+00 : f32
    %185 = vector.shape_cast %44 : vector<1x256xi1> to vector<1x256xi1>
    %186 = vector.broadcast %185 : vector<1x256xi1> to vector<4x256xi1>
    %187 = vector.broadcast %cst_85 : f32 to vector<4x256xf32>
    %188 = arith.select %186, %184, %187 : vector<4x256xi1>, vector<4x256xf32>
    %189 = arith.addf %180, %188 : vector<4x256xf32>
    %c0_86 = arith.constant 0 : index
    %c0_87 = arith.constant 0 : index
    %190 = vector.load %arg10[%c0_86, %c0_87] : memref<4x1xf32, #tpu.memory_space<vmem>>, vector<4x1xf32>
    %191 = vector.broadcast %190 : vector<4x1xf32> to vector<4x256xf32>
    %192 = arith.addf %189, %191 : vector<4x256xf32>
    %193 = vector.extract_strided_slice %192 {offsets = [0, 0], sizes = [2, 256], strides = [1, 1]} : vector<4x256xf32> to vector<2x256xf32>
    %194 = vector.extract_strided_slice %192 {offsets = [2, 0], sizes = [2, 256], strides = [1, 1]} : vector<4x256xf32> to vector<2x256xf32>
    %cst_88 = arith.constant 2.000000e+00 : f32
    %195 = vector.broadcast %cst_88 : f32 to vector<2x256xf32>
    %196 = arith.addf %193, %195 : vector<2x256xf32>
    %197 = arith.negf %196 : vector<2x256xf32>
    %198 = math.exp %197 : vector<2x256xf32>
    %cst_89 = arith.constant 1.000000e+00 : f32
    %199 = vector.broadcast %cst_89 : f32 to vector<2x256xf32>
    %200 = arith.addf %199, %198 : vector<2x256xf32>
    %201 = arith.divf %199, %200 : vector<2x256xf32>
    %202 = arith.addf %52, %194 : vector<2x256xf32>
    %203 = arith.mulf %202, %201 : vector<2x256xf32>
    %c0_90 = arith.constant 0 : index
    %c0_91 = arith.constant 0 : index
    %204 = vector.load %arg11[%c0_90, %c0_91] : memref<4x256xf32, #tpu.memory_space<vmem>>, vector<2x256xf32>
    tpu.vector_store %arg11[%c0_90, %c0_91], %51 {strides = array<i32>} : memref<4x256xf32, #tpu.memory_space<vmem>>, vector<2x256xf32>,
    %c2_92 = arith.constant 2 : index
    %c0_93 = arith.constant 0 : index
    %205 = vector.load %arg11[%c2_92, %c0_93] : memref<4x256xf32, #tpu.memory_space<vmem>>, vector<2x256xf32>
    tpu.vector_store %arg11[%c2_92, %c0_93], %203 {strides = array<i32>} : memref<4x256xf32, #tpu.memory_space<vmem>>, vector<2x256xf32>,
    %206 = math.log %201 : vector<2x256xf32>
    %207 = vector.shape_cast %206 : vector<2x256xf32> to vector<1x2x256xf32>
    %cst_94 = arith.constant dense<0.000000e+00> : vector<1xf32>
    %208 = vector.multi_reduction <add>, %207, %cst_94 [1, 2] : vector<1x2x256xf32> to vector<1xf32>
    %209 = vector.shape_cast %208 : vector<1xf32> to vector<1x1x1xf32>
    %210 = vector.extract %209[0, 0, 0] : f32 from vector<1x1x1xf32>
    %211 = vector.broadcast %210 : f32 to vector<1x1xf32>
    %c0_95 = arith.constant 0 : index
    %c0_96 = arith.constant 0 : index
    %c0_97 = arith.constant 0 : index
    %212 = vector.load %arg12[%c0_95, %c0_96, %c0_97] : memref<1x1x1xf32, #tpu.memory_space<vmem>>, vector<1x1x1xf32>
    %213 = vector.shape_cast %212 : vector<1x1x1xf32> to vector<1x1xf32>
    %214 = vector.shape_cast %211 : vector<1x1xf32> to vector<1x1x1xf32>
    tpu.vector_store %arg12[%c0_95, %c0_96, %c0_97], %214 {strides = array<i32>} : memref<1x1x1xf32, #tpu.memory_space<vmem>>, vector<1x1x1xf32>,
    return
  }
  func.func @transform_0(%arg0: i32) -> (i32, i32) {
    %c0_i32 = arith.constant 0 : i32
    %c0_i32_0 = arith.constant 0 : i32
    return %c0_i32, %arg0 : i32, i32
  }
  func.func @transform_1(%arg0: i32) -> (i32, i32) {
    %c0_i32 = arith.constant 0 : i32
    %c0_i32_0 = arith.constant 0 : i32
    return %c0_i32, %arg0 : i32, i32
  }
  func.func @transform_2(%arg0: i32) -> (i32, i32) {
    %c0_i32 = arith.constant 0 : i32
    %c0_i32_0 = arith.constant 0 : i32
    %c0_i32_1 = arith.constant 0 : i32
    return %c0_i32, %c0_i32_0 : i32, i32
  }
  func.func @transform_3(%arg0: i32) -> (i32, i32) {
    %c0_i32 = arith.constant 0 : i32
    %c0_i32_0 = arith.constant 0 : i32
    %c0_i32_1 = arith.constant 0 : i32
    return %c0_i32, %c0_i32_0 : i32, i32
  }
  func.func @transform_4(%arg0: i32) -> (i32, i32) {
    %c0_i32 = arith.constant 0 : i32
    %c0_i32_0 = arith.constant 0 : i32
    %c0_i32_1 = arith.constant 0 : i32
    return %c0_i32, %c0_i32_0 : i32, i32
  }
  func.func @transform_5(%arg0: i32) -> (i32, i32) {
    %c0_i32 = arith.constant 0 : i32
    %c0_i32_0 = arith.constant 0 : i32
    %c0_i32_1 = arith.constant 0 : i32
    return %c0_i32, %c0_i32_0 : i32, i32
  }
  func.func @transform_6(%arg0: i32) -> (i32, i32) {
    %c0_i32 = arith.constant 0 : i32
    %c0_i32_0 = arith.constant 0 : i32
    %c0_i32_1 = arith.constant 0 : i32
    return %c0_i32, %c0_i32_0 : i32, i32
  }
  func.func @transform_7(%arg0: i32) -> (i32, i32) {
    %c0_i32 = arith.constant 0 : i32
    %c0_i32_0 = arith.constant 0 : i32
    %c0_i32_1 = arith.constant 0 : i32
    return %c0_i32, %c0_i32_0 : i32, i32
  }
  func.func @transform_8(%arg0: i32) -> (i32, i32, i32) {
    %c0_i32 = arith.constant 0 : i32
    %c0_i32_0 = arith.constant 0 : i32
    %c0_i32_1 = arith.constant 0 : i32
    %c0_i32_2 = arith.constant 0 : i32
    return %c0_i32, %c0_i32_0, %c0_i32_1 : i32, i32, i32
  }
  func.func @transform_9(%arg0: i32) -> (i32, i32) {
    %c0_i32 = arith.constant 0 : i32
    %c0_i32_0 = arith.constant 0 : i32
    %c0_i32_1 = arith.constant 0 : i32
    return %c0_i32, %c0_i32_0 : i32, i32
  }
  func.func @transform_10(%arg0: i32) -> (i32, i32) {
    %c0_i32 = arith.constant 0 : i32
    %c0_i32_0 = arith.constant 0 : i32
    return %c0_i32, %arg0 : i32, i32
  }
  func.func @transform_11(%arg0: i32) -> (i32, i32, i32) {
    %c0_i32 = arith.constant 0 : i32
    %c0_i32_0 = arith.constant 0 : i32
    %c0_i32_1 = arith.constant 0 : i32
    return %arg0, %c0_i32, %c0_i32_0 : i32, i32, i32
  }
}

</mosaic_0001>

<bundles_post_ra>
// kernel: glow_step_forward.1
= control target key start
LH: loop header
LB: loop body
LE: loop exit
PB: predicated region body
PF: predicated region fallthrough
CT: control target
= control target key end

     0   :  { %s1686_s17 = smov 0   ;;  %s2082_s0 = inlined_call_operand.vmem [shape: f32[4,512], index: 0, kind: input, shape index: {}]   ;;  %s2083_s1 = inlined_call_operand.vmem [shape: f32[4,512], index: 1, kind: input, shape index: {}]   ;;  %s2084_s2 = inlined_call_operand.vmem [shape: f32[4,4], index: 2, kind: input, shape index: {}]   ;;  %s2085_s3 = inlined_call_operand.vmem [shape: f32[4,1], index: 3, kind: input, shape index: {}]   ;;  %s2086_s4 = inlined_call_operand.vmem [shape: bf16[32,54], index: 4, kind: input, shape index: {}]   ;;  %s2087_s5 = inlined_call_operand.vmem [shape: f32[32,1], index: 5, kind: input, shape index: {}]   ;;  %s2088_s6 = inlined_call_operand.vmem [shape: bf16[32,32], index: 6, kind: input, shape index: {}]   ;;  %s2089_s7 = inlined_call_operand.vmem [shape: f32[32,1], index: 7, kind: input, shape index: {}]   ;;  %s2090_s8 = inlined_call_operand.vmem [shape: bf16[9,4,32], index: 8, kind: input, shape index: {}]   ;;  %s2091_s9 = inlined_call_operand.vmem [shape: f32[4,1], index: 9, kind: input, shape index: {}]   ;;  %s2092_s10 = inlined_call_operand.vmem [shape: f32[4,512], index: 10, kind: output, shape index: {0}]   ;;  %s2093_s11 = inlined_call_operand.vmem [shape: f32[2,1,1], index: 11, kind: output, shape index: {1}]  }
   0x1 LB: > { %s1692_s18 = sadd.s32 4294967295, %s1615_s17   ;;  %p1466_p0 = scmp.ge.s32.totalorder %s1615_s17, 1  ;;  %s1615_s17 = sphi %s1686_s17, %s22_s17  }
   0x2   : > { %p352_p1 = scmp.lt.s32.totalorder %s1615_s17, 3 }
   0x4   : > { %p353_p2 = pnand %p1466_p0, %p352_p1 }
   0x5   : > { %s1467_s19 = sshll.u32 (!%p353_p2), %s1692_s18, 1  ;;  %s1618_s15 = smov (!%p353_p2), 112  }
   0x6   : > { %356 = sbr.rel (%p353_p2) target bundleno = 1170 (0x492), region = 60  ;;  %p401_p3 = scmp.lt.s32.totalorder (!%p353_p2), %s1467_s19, 3 }
   0x7   : > { %s1619_s16 = smov (!%p353_p2), 127   ;;  %s1621_s20 = smov (!%p353_p2), 15  }
   0x8   : > { %s1622_s21 = smov (!%p353_p2), 113   ;;  %s1625_s26 = smov (!%p353_p2), 16  }
   0x9   : > { %p418_p4 = scmp.lt.s32.totalorder (!%p353_p2), %s1692_s18, 1 }
   0xb   : > { %v1617_v0 = vmov 0   ;;  %v491_v1 = vld [vmem:[%s2085_s3] sm:$0xf]  ;;  %s2123_s19 = smov (!%p401_p3, %s1467_s19), 3  ;;  %vm505_vm0 = vcmask 1043456   ;;  %vm501_vm1 = vcmask 31744   ;;  %v422_v24 = vlaneseq }
   0xc   : > { %1554 = vset.pattern.permute.xlu0 %v1617_v0  ;;  %1595 = vset.pattern.permute.xlu1 %v1617_v0  ;;  %s1468_s22 = sshll.u32 %s2123_s19, 2  ;;  %v489_v4 = vld [vmem:[%s2084_s2] sm:$0xf]  ;;  %vm2098_vm2 = vcmask 1041408   ;;  %s1620_s19 = smov 111   ;;  %v729_v21 = vld [vmem:[%s2087_s5 + $0x10] sm:$0xff] }
   0xd   : > { %494 = vperm.xlu0 %1554, %v491_v1   ;;  %1596 = vset.pattern.permute.xlu2 %v1617_v0  ;;  %s404_s25 = scalar_lea.vmem %s2082_s0, %s1468_s22  ;;  %s410_s28 = scalar_lea.vmem %s2083_s1, %s1468_s22  ;;  %v728_v22 = vld [vmem:[%s2087_s5 + $0x8] sm:$0xff]  ;;  %v829_v23 = vld [vmem:[%s2089_s7] sm:$0xff]  ;;  %v1751_v25 = vand.u32 127, %v422_v24  ;;  %vm768_vm13 = vcmask 1042432  }
   0xe   : > { %v490_v2 = vld [vmem:[%s404_s25] sm:$0xff]  ;;  %s1718_s14 = scalar_lea.vmem %s2092_s10, %s1468_s22  ;;  %s1623_s22 = smov 1  }
   0xf   : > { %498 = vst [vmem:[#allocation1] ss:$2 sm:$0xff] %v490_v2  ;;  %v550_v3 = vld [vmem:[%s410_s28] sm:$0xff]  ;;  %s1624_s25 = smov 17   ;;  %v424_v27 = vadd.s32 128, %v1751_v25  ;;  %v453_v29 = vand.u32 15, %v1751_v25 }
  0x10   : > { %v429_v30 = vand.u32 255, %v1751_v25  ;;  %vm2096_vm3 = vcmp.lt.s32.totalorder %v1751_v25, 112  ;;  %vm592_vm4 = vcmp.lt.s32.totalorder %v1751_v25, 15  ;;  %vm2094_vm8 = vcmp.lt.s32.totalorder %v1751_v25, 111  ;;  %s2125_s18 = smov (!%p418_p4, %s1692_s18), 1 }
  0x11   : > { %v436_v28 = vand.u32 255, %v424_v27  ;;  %v460_v32 = vand.u32 15, %v424_v27  ;;  %vm1762_vm6 = vcmp.lt.s32.totalorder %v453_v29, 15  ;;  %vm618_vm10 = vcmp.lt.s32.totalorder %v1751_v25, 127 }
  0x12   : > { %vm1766_vm7 = vcmp.ge.s32.totalorder %v429_v30, 16  ;;  %vm1782_vm12 = vcmp.ge.s32.totalorder %v453_v29, 1 }
  0x13   : > { %vm1758_vm5 = vcmp.lt.s32.totalorder %v436_v28, 240  ;;  %vm1771_vm9 = vcmp.lt.s32.totalorder %v460_v32, 15  ;;  %vm1786_vm14 = vcmp.ge.s32.totalorder %v460_v32, 1  ;;  %vm483_vm15 = vmand %vm1766_vm7, %vm1762_vm6  ;;  %v730_v32 = vld [vmem:[%s2087_s5 + $0x18] sm:$0xff] }
  0x14   : > { %vm2095_vm11 = vmand %vm1758_vm5, %vm1771_vm9 }
  0x16   : > { %v499_v5 = vld.sshfl [vmem:[#allocation1] sm:$0xff pattern:$0x75316420]  ;;  %v500_v6 = vld.sshfl [vmem:[#allocation1 + $0x8] sm:$0xff pattern:$0x75316420] }
  0x17   : > { %1473 = vmatpush.msk.msra.mxu2 %vm505_vm0, %v499_v5  ;;  %1475 = vmatpush.msk.msra.mxu3 %vm505_vm0, %v500_v6  ;;  %552 = vst [vmem:[#allocation1] ss:$2 sm:$0xff] %v550_v3 }
  0x18   : > { %1474 = vmatmul.msk.f32.vlgmr.msra.gmra.mxu2 %vm501_vm1, %v489_v4  ;;  %1476 = vmatmul.msk.f32.vlgmr.msra.gmra.mxu3 %vm501_vm1, %v489_v4  ;;  %vm2099_vm1 = vcmp.lt.s32.totalorder %v1751_v25, 113 }
  0x1e   : > { %v553_v7 = vld.sshfl [vmem:[#allocation1] sm:$0xff pattern:$0x75316420]  ;;  %v554_v8 = vld.sshfl [vmem:[#allocation1 + $0x8] sm:$0xff pattern:$0x75316420] }
  0x1f   : > { %v555_v10 = vrot.slane %v553_v7, 6  ;;  %v556_v11 = vrot.slane %v554_v8, 6 }
  0x7f   : > { %v495_v9 = vpop.permute.xlu0 %494 }
  0x9b   : > { %v527_v12 = vpop.f32.mrf.mxu2  ;;  %v547_v13 = vpop.f32.mrf.mxu3 }
  0x9c   : > { %v1711_v14 = vadd.f32 %v527_v12, %v495_v9  ;;  %v1713_v15 = vadd.f32 %v547_v13, %v495_v9 }
  0x9e   : > { %v1722_v16 = vsel %vm2098_vm2, %v1711_v14, %v555_v10  ;;  %v1726_v17 = vsel %vm2098_vm2, %v1713_v15, %v556_v11  ;;  %v1340_v18 = vrot.slane %v1713_v15, 4 }
  0x9f   : > { %v1570_v19 = vpack.i.bf16 %v1726_v17, %v1722_v16 }
  0xa0   : > { %v1341_v20 = vsel %vm505_vm0, %v1711_v14, %v1340_v18 }
  0xa1   : > { %1343 = vst [vmem:[%s1718_s14] sm:$0x33] %v1341_v20  ;;  %1571 = vrot.lane.b32.xlu2 %v1570_v19, %s1618_s15  ;;  %1561 = vrot.lane.b32.xlu1 %v1570_v19, %s1619_s16 }
  0xa2   : > { %1556 = vrot.lane.b32.xlu0 %v1570_v19, %s1620_s19 }
  0xa9   : > { %1576 = vrot.lane.b32.xlu2 %v1570_v19, %s1621_s20  ;;  %1566 = vrot.lane.b32.xlu1 %v1570_v19, %s1622_s21 }
  0xaa   : > { %1581 = vrot.lane.b32.xlu0 %v1570_v19, %s1623_s22 }
  0xb1   : > { %1591 = vrot.lane.b32.xlu2 %v1570_v19, %s1624_s25  ;;  %1586 = vrot.lane.b32.xlu1 %v1570_v19, %s1625_s26 }
  0xb2   : > { %743 = vperm.xlu0 %1554, %v729_v21  }
  0xb9   : > { %748 = vperm.xlu1 %1595, %v730_v32  }
  0xba   : > { %738 = vperm.xlu0 %1554, %v728_v22  }
  0xc2   : > { %835 = vperm.xlu0 %1554, %v829_v23  }
  0xfb   : > { %v1572_v26 = vpop.permute.xlu2 %1571 }
  0xfc   : > { %v1574_v33 = vunpack.i.h.bf16 %v1572_v26  ;;  %v1573_v34 = vunpack.i.l.bf16 %v1572_v26 }
  0xfe   : > { %v646_v47 = vsel %vm2096_vm3, %v1574_v33, %v1573_v34  ;;  %v645_v58 = vsel %vm2096_vm3, %v1573_v34, %v1574_v33  ;;  %vm2097_vm3 = vmand %vm1758_vm5, %vm1786_vm14 }
  0xff   : > { %v652_v61 = vsel %vm1758_vm5, %v646_v47, 0.0  ;;  %v698_v5 = vrot.slane %v645_v58, 6 }
 0x100   : > { %v699_v9 = vrot.slane %v652_v61, 6 }
 0x103   : > { %v1577_v31 = vpop.permute.xlu2 %1576 }
 0x104   : > { %v1579_v36 = vunpack.i.h.bf16 %v1577_v31  ;;  %v1578_v37 = vunpack.i.l.bf16 %v1577_v31 }
 0x106   : > { %v593_v50 = vsel %vm592_vm4, %v1578_v37, %v1579_v36  ;;  %v594_v51 = vsel %vm592_vm4, %v1579_v36, %v1578_v37 }
 0x107   : > { %v1824_v62 = vsel %vm483_vm15, %v594_v51, 0.0  ;;  %v600_v63 = vsel %vm1771_vm9, %v593_v50, 0.0 }
 0x108   : > { %v674_v12 = vrot.slane %v1824_v62, 4  ;;  %v675_v13 = vrot.slane %v600_v63, 4 }
 0x10b   : > { %v1592_v18 = vpop.permute.xlu2 %1591 }
 0x10c   : > { %v1594_v33 = vunpack.i.h.bf16 %v1592_v18  ;;  %v1593_v34 = vunpack.i.l.bf16 %v1592_v18 }
 0x113   : > { %v1562_v38 = vpop.permute.xlu1 %1561 }
 0x114   : > { %v1564_v41 = vunpack.i.h.bf16 %v1562_v38  ;;  %v1563_v42 = vunpack.i.l.bf16 %v1562_v38  ;;  %v1557_v43 = vpop.permute.xlu0 %1556  ;;  %v727_v38 = vld [vmem:[%s2087_s5] sm:$0xff] }
 0x115   : > { %v1559_v45 = vunpack.i.h.bf16 %v1557_v43  ;;  %v1558_v46 = vunpack.i.l.bf16 %v1557_v43  ;;  %733 = vperm.xlu2 %1596, %v727_v38  }
 0x116   : > { %v619_v54 = vsel %vm618_vm10, %v1563_v42, %v1564_v41  ;;  %v620_v55 = vsel %vm618_vm10, %v1564_v41, %v1563_v42 }
 0x117   : > { %v658_v52 = vsel %vm2094_vm8, %v1558_v46, %v1559_v45  ;;  %v659_v53 = vsel %vm2094_vm8, %v1559_v45, %v1558_v46  ;;  %vm605_vm8 = vcmp.lt.s32.totalorder %v1751_v25, 1  ;;  %v625_v3 = vsel %vm1762_vm6, %v619_v54, 0.0 }
 0x118   : > { %v664_v56 = vsel %vm1762_vm6, %v658_v52, 0.0  ;;  %v665_v57 = vsel %vm2095_vm11, %v659_v53, 0.0  ;;  %vm566_vm11 = vcmp.lt.s32.totalorder %v1751_v25, 17  ;;  %v626_v4 = vsel %vm1771_vm9, %v620_v55, 0.0 }
 0x119   : > { %v721_v59 = vpack.c.bf16 %v664_v56, %v664_v56  ;;  %v722_v60 = vpack.c.bf16 %v665_v57, %v665_v57  ;;  %v686_v21 = vrot.slane %v625_v3, 2  ;;  %v687_v22 = vrot.slane %v626_v4, 2 }
 0x11a   : > { %v568_v55 = vsel %vm566_vm11, %v1594_v33, %v1593_v34  ;;  %v567_v56 = vsel %vm566_vm11, %v1593_v34, %v1594_v33 }
 0x11b   : > { %v1567_v0 = vpop.permute.xlu1 %1566  ;;  %v770_v1 = vsel %vm768_vm13, %v721_v59, 0  ;;  %v773_v2 = vsel %vm768_vm13, %v722_v60, 0  ;;  %vm579_vm13 = vcmp.lt.s32.totalorder %v1751_v25, 16 }
 0x11c   : > { %v1569_v6 = vunpack.i.h.bf16 %v1567_v0  ;;  %v1568_v7 = vunpack.i.l.bf16 %v1567_v0  ;;  %v1582_v8 = vpop.permute.xlu0 %1581  ;;  %779 = vmatpush.bf16.msrb.mxu2 %v770_v1  ;;  %798 = vmatpush.bf16.msrb.mxu3 %v773_v2  ;;  %v831_v1 = vld [vmem:[%s2089_s7 + $0x10] sm:$0xff]  ;;  %v574_v2 = vsel %vm1786_vm14, %v567_v56, 0.0  ;;  %v1533_v56 = vld [vmem:[%s2088_s6] sm:$0xff] }
 0x11d   : > { %v1584_v10 = vunpack.i.h.bf16 %v1582_v8  ;;  %v1583_v11 = vunpack.i.l.bf16 %v1582_v8  ;;  %845 = vperm.xlu1 %1595, %v831_v1  }
 0x11e   : > { %v632_v19 = vsel %vm2099_vm1, %v1568_v7, %v1569_v6  ;;  %v633_v20 = vsel %vm2099_vm1, %v1569_v6, %v1568_v7  ;;  %vm761_vm1 = vcmask 441344  }
 0x11f   : > { %v606_v23 = vsel %vm605_vm8, %v1583_v11, %v1584_v10  ;;  %v607_v24 = vsel %vm605_vm8, %v1584_v10, %v1583_v11  ;;  %v638_v26 = vsel %vm1782_vm12, %v632_v19, 0.0  ;;  %v639_v27 = vsel %vm2097_vm3, %v633_v20, 0.0  ;;  %v1531_v10 = vld [vmem:[%s2086_s4] sm:$0xff]  ;;  %v830_v11 = vld [vmem:[%s2089_s7 + $0x8] sm:$0xff] }
 0x120   : > { %v692_v28 = vrot.slane %v638_v26, 4  ;;  %v693_v29 = vrot.slane %v639_v27, 4  ;;  %v612_v30 = vsel %vm1782_vm12, %v607_v24, 0.0  ;;  %v613_v31 = vsel %vm1786_vm14, %v606_v23, 0.0 }
 0x121   : > { %v680_v36 = vrot.slane %v612_v30, 6  ;;  %v681_v37 = vrot.slane %v613_v31, 6  ;;  %vm702_vm3 = vcmask 1045504  }
 0x122   : > { %v711_v41 = vsel %vm505_vm0, %v686_v21, %v692_v28  ;;  %v713_v42 = vsel %vm2098_vm2, %v692_v28, %v698_v5  ;;  %v712_v43 = vsel %vm505_vm0, %v687_v22, %v693_v29  ;;  %v714_v45 = vsel %vm2098_vm2, %v693_v29, %v699_v9 }
 0x123   : > { %v1587_v46 = vpop.permute.xlu1 %1586  ;;  %v719_v47 = vpack.c.bf16 %v713_v42, %v711_v41  ;;  %v720_v50 = vpack.c.bf16 %v714_v45, %v712_v43  ;;  %v707_v53 = vsel %vm2098_vm2, %v674_v12, %v680_v36  ;;  %v708_v54 = vsel %vm2098_vm2, %v675_v13, %v681_v37  ;;  %vm481_vm2 = vmand %vm1766_vm7, %vm1782_vm12 }
 0x124   : > { %v1589_v51 = vunpack.i.h.bf16 %v1587_v46  ;;  %v1588_v52 = vunpack.i.l.bf16 %v1587_v46  ;;  %v709_v59 = vsel %vm702_vm3, %v1722_v16, %v686_v21  ;;  %v710_v60 = vsel %vm702_vm3, %v1726_v17, %v687_v22  ;;  %v832_v16 = vld [vmem:[%s2089_s7 + $0x18] sm:$0xff]  ;;  %v744_v21 = vpop.permute.xlu0 %743 }
 0x125   : > { %780 = vmatpush.bf16.msrb.mxu2 %v719_v47  ;;  %799 = vmatpush.bf16.msrb.mxu3 %v720_v50  ;;  %v717_v62 = vpack.c.bf16 %v709_v59, %v707_v53  ;;  %v718_v63 = vpack.c.bf16 %v710_v60, %v708_v54  ;;  %v573_v3 = vsel %vm481_vm2, %v568_v55, 0.0 }
 0x126   : > { %v580_v57 = vsel %vm579_vm13, %v1588_v52, %v1589_v51  ;;  %v581_v58 = vsel %vm579_vm13, %v1589_v51, %v1588_v52  ;;  %850 = vperm.xlu2 %1596, %v832_v16   ;;  %840 = vperm.xlu1 %1595, %v830_v11  }
 0x127   : > { %v669_v61 = vrot.slane %v580_v57, 2  ;;  %v586_v0 = vsel %vm1766_vm7, %v581_v58, 0.0  ;;  %v1534_v57 = vld [vmem:[%s2088_s6 + $0x8] sm:$0xff] }
 0x128   : > { %v668_v17 = vrot.slane %v586_v0, 2 }
 0x129   : > { %781 = vmatpush.bf16.msrb.mxu2 %v717_v62  ;;  %800 = vmatpush.bf16.msrb.mxu3 %v718_v63  ;;  %v704_v4 = vsel %vm702_vm3, %v574_v2, %v669_v61  ;;  %v706_v5 = vsel %vm505_vm0, %v669_v61, %v675_v13 }
 0x12a   : > { %v703_v6 = vsel %vm702_vm3, %v573_v3, %v668_v17  ;;  %v705_v7 = vsel %vm505_vm0, %v668_v17, %v674_v12  ;;  %v716_v8 = vpack.c.bf16 %v706_v5, %v704_v4  ;;  %v1532_v12 = vld [vmem:[%s2086_s4 + $0x8] sm:$0xff]  ;;  %vm863_vm3 = vcmask 261120  }
 0x12b   : > { %v715_v9 = vpack.c.bf16 %v705_v7, %v703_v6  ;;  %v749_v27 = vpop.permute.xlu1 %748 }
 0x12c   : > { %v739_v24 = vpop.permute.xlu0 %738 }
 0x12d   : > { %782 = vmatpush.bf16.msrb.mxu2 %v715_v9  ;;  %801 = vmatpush.bf16.msrb.mxu3 %v716_v8 }
 0x130   : > { %1485 = vmatmul.msk.bf16.vlgmr.msrb.gmra.mxu2 %vm761_vm1, %v1531_v10  ;;  %1487 = vmatmul.msk.bf16.vlgmr.msrb.gmra.mxu3 %vm761_vm1, %v1531_v10 }
 0x134   : > { %v836_v5 = vpop.permute.xlu0 %835 }
 0x140   : > { %1486 = vmatmul.msk.bf16.gmra.mxu2 %vm761_vm1, %v1532_v12  ;;  %1488 = vmatmul.msk.bf16.gmra.mxu3 %vm761_vm1, %v1532_v12 }
 0x16f   : > { %v734_v26 = vpop.permute.xlu2 %733 }
 0x180   : > { %v851_v16 = vpop.permute.xlu2 %850 }
 0x18f   : > { %v846_v62 = vpop.permute.xlu1 %845 }
 0x198   : > { %v841_v1 = vpop.permute.xlu1 %840 }
 0x1b3   : > { %v784_v13 = vpop.f32.mrf.mxu2  ;;  %v803_v18 = vpop.f32.mrf.mxu3 }
 0x1b4   : > { %v785_v37 = vadd.f32 %v784_v13, %v734_v26  ;;  %v804_v38 = vadd.f32 %v803_v18, %v734_v26 }
 0x1b6   : > { %v813_v52 = vmax.f32 %v785_v37, 0.0  ;;  %v814_v53 = vmax.f32 %v804_v38, 0.0  ;;  %v1521_v37 = vld [vmem:[%s2090_s8 + $0xe] sm:$0x3]  ;;  %v1524_v38 = vld [vmem:[%s2090_s8 + $0x10] sm:$0x3] }
 0x1bb   : > { %v786_v19 = vpop.f32.mrf.mxu2  ;;  %v805_v20 = vpop.f32.mrf.mxu3 }
 0x1bc   : > { %v787_v32 = vadd.f32 %v786_v19, %v739_v24  ;;  %v806_v33 = vadd.f32 %v805_v20, %v739_v24 }
 0x1be   : > { %v815_v46 = vmax.f32 %v787_v32, 0.0  ;;  %v816_v47 = vmax.f32 %v806_v33, 0.0  ;;  %v1509_v32 = vld [vmem:[%s2090_s8 + $0x6] sm:$0x3]  ;;  %v1512_v33 = vld [vmem:[%s2090_s8 + $0x8] sm:$0x3] }
 0x1c0   : > { %v825_v54 = vpack.c.bf16 %v815_v46, %v813_v52  ;;  %v826_v55 = vpack.c.bf16 %v816_v47, %v814_v53 }
 0x1c3   : > { %v789_v22 = vpop.f32.mrf.mxu2  ;;  %v808_v23 = vpop.f32.mrf.mxu3 }
 0x1c4   : > { %v790_v28 = vadd.f32 %v789_v22, %v744_v21  ;;  %v809_v29 = vadd.f32 %v808_v23, %v744_v21 }
 0x1c6   : > { %v817_v41 = vmax.f32 %v790_v28, 0.0  ;;  %v818_v42 = vmax.f32 %v809_v29, 0.0  ;;  %v920_v29 = vld [vmem:[%s2090_s8] sm:$0x3] }
 0x1cb   : > { %v791_v30 = vpop.f32.mrf.mxu2  ;;  %v810_v31 = vpop.f32.mrf.mxu3 }
 0x1cc   : > { %v792_v34 = vadd.f32 %v791_v30, %v749_v27  ;;  %v811_v36 = vadd.f32 %v810_v31, %v749_v27  ;;  %v1503_v30 = vld [vmem:[%s2090_s8 + $0x2] sm:$0x3]  ;;  %v1506_v31 = vld [vmem:[%s2090_s8 + $0x4] sm:$0x3] }
 0x1ce   : > { %v819_v43 = vmax.f32 %v792_v34, 0.0  ;;  %v820_v45 = vmax.f32 %v811_v36, 0.0  ;;  %v1515_v34 = vld [vmem:[%s2090_s8 + $0xa] sm:$0x3]  ;;  %v1518_v36 = vld [vmem:[%s2090_s8 + $0xc] sm:$0x3] }
 0x1d0   : > { %v827_v50 = vpack.c.bf16 %v819_v43, %v817_v41  ;;  %v828_v51 = vpack.c.bf16 %v820_v45, %v818_v42 }
 0x1d2   : > { %876 = vmatpush.bf16.msra.mxu0 %v827_v50  ;;  %895 = vmatpush.bf16.msra.mxu1 %v828_v51 }
 0x1d6   : > { %877 = vmatpush.bf16.msra.mxu0 %v825_v54  ;;  %896 = vmatpush.bf16.msra.mxu1 %v826_v55 }
 0x1d9   : > { %1497 = vmatmul.msk.bf16.vlgmr.msra.gmra.mxu0 %vm863_vm3, %v1533_v56  ;;  %1499 = vmatmul.msk.bf16.vlgmr.msra.gmra.mxu1 %vm863_vm3, %v1533_v56 }
 0x1e9   : > { %1498 = vmatmul.msk.bf16.gmra.mxu0 %vm863_vm3, %v1534_v57  ;;  %1500 = vmatmul.msk.bf16.gmra.mxu1 %vm863_vm3, %v1534_v57 }
 0x256   : > { %v879_v58 = vpop.f32.mrf.mxu0  ;;  %v898_v59 = vpop.f32.mrf.mxu1 }
 0x257   : > { %v880_v10 = vadd.f32 %v879_v58, %v836_v5  ;;  %v899_v11 = vadd.f32 %v898_v59, %v836_v5 }
 0x259   : > { %v908_v24 = vmax.f32 %v880_v10, 0.0  ;;  %v909_v26 = vmax.f32 %v899_v11, 0.0 }
 0x25e   : > { %v881_v60 = vpop.f32.mrf.mxu0  ;;  %v900_v61 = vpop.f32.mrf.mxu1 }
 0x25f   : > { %v882_v6 = vadd.f32 %v881_v60, %v841_v1  ;;  %v901_v7 = vadd.f32 %v900_v61, %v841_v1 }
 0x261   : > { %v910_v20 = vmax.f32 %v882_v6, 0.0  ;;  %v911_v21 = vmax.f32 %v901_v7, 0.0 }
 0x263   : > { %v916_v27 = vpack.c.bf16 %v910_v20, %v908_v24  ;;  %v917_v28 = vpack.c.bf16 %v911_v21, %v909_v26 }
 0x266   : > { %v884_v63 = vpop.f32.mrf.mxu0  ;;  %v903_v0 = vpop.f32.mrf.mxu1 }
 0x267   : > { %v885_v17 = vadd.f32 %v884_v63, %v846_v62  ;;  %v904_v2 = vadd.f32 %v903_v0, %v846_v62 }
 0x269   : > { %v912_v12 = vmax.f32 %v885_v17, 0.0  ;;  %v913_v13 = vmax.f32 %v904_v2, 0.0 }
 0x26e   : > { %v886_v3 = vpop.f32.mrf.mxu0  ;;  %v905_v4 = vpop.f32.mrf.mxu1 }
 0x26f   : > { %v887_v8 = vadd.f32 %v886_v3, %v851_v16  ;;  %v906_v9 = vadd.f32 %v905_v4, %v851_v16 }
 0x271   : > { %v914_v18 = vmax.f32 %v887_v8, 0.0  ;;  %v915_v19 = vmax.f32 %v906_v9, 0.0  ;;  %v1280_v8 = vld [vmem:[%s2091_s9] sm:$0xf] }
 0x273   : > { %v918_v22 = vpack.c.bf16 %v914_v18, %v912_v12  ;;  %v919_v23 = vpack.c.bf16 %v915_v19, %v913_v13 }
 0x275   : > { %930 = vmatpush.bf16.msrb.mxu0 %v918_v22  ;;  %943 = vmatpush.bf16.msrb.mxu1 %v919_v23 }
 0x276   : > { %971 = vmatpush.bf16.msra.mxu2 %v918_v22  ;;  %984 = vmatpush.bf16.msra.mxu3 %v919_v23 }
 0x279   : > { %931 = vmatpush.bf16.msrb.mxu0 %v916_v27  ;;  %944 = vmatpush.bf16.msrb.mxu1 %v917_v28 }
 0x27a   : > { %972 = vmatpush.bf16.msra.mxu2 %v916_v27  ;;  %985 = vmatpush.bf16.msra.mxu3 %v917_v28 }
 0x27c   : > { %1501 = vmatmul.msk.bf16.vlgmr.msrb.gmra.mxu0 %vm863_vm3, %v920_v29  ;;  %1502 = vmatmul.msk.bf16.vlgmr.msrb.gmra.mxu1 %vm863_vm3, %v920_v29 }
 0x27d   : > { %1012 = vmatpush.bf16.msra.mxu0 %v918_v22  ;;  %1025 = vmatpush.bf16.msra.mxu1 %v919_v23 }
 0x27e   : > { %1053 = vmatpush.bf16.msrb.mxu2 %v918_v22  ;;  %1066 = vmatpush.bf16.msrb.mxu3 %v919_v23 }
 0x27f   : > { %1504 = vmatmul.msk.bf16.vlgmr.msra.gmra.mxu2 %vm863_vm3, %v1503_v30  ;;  %1505 = vmatmul.msk.bf16.vlgmr.msra.gmra.mxu3 %vm863_vm3, %v1503_v30 }
 0x281   : > { %1013 = vmatpush.bf16.msra.mxu0 %v916_v27  ;;  %1026 = vmatpush.bf16.msra.mxu1 %v917_v28 }
 0x282   : > { %1054 = vmatpush.bf16.msrb.mxu2 %v916_v27  ;;  %1067 = vmatpush.bf16.msrb.mxu3 %v917_v28 }
 0x285   : > { %1094 = vmatpush.bf16.msrb.mxu0 %v918_v22  ;;  %1107 = vmatpush.bf16.msrb.mxu1 %v919_v23 }
 0x286   : > { %1127 = vmatpush.bf16.msra.mxu2 %v918_v22  ;;  %1140 = vmatpush.bf16.msra.mxu3 %v919_v23 }
 0x289   : > { %1095 = vmatpush.bf16.msrb.mxu0 %v916_v27  ;;  %1108 = vmatpush.bf16.msrb.mxu1 %v917_v28 }
 0x28a   : > { %1128 = vmatpush.bf16.msra.mxu2 %v916_v27  ;;  %1141 = vmatpush.bf16.msra.mxu3 %v917_v28 }
 0x28c   : > { %1507 = vmatmul.msk.bf16.vlgmr.msra.gmra.mxu0 %vm863_vm3, %v1506_v31  ;;  %1508 = vmatmul.msk.bf16.vlgmr.msra.gmra.mxu1 %vm863_vm3, %v1506_v31 }
 0x28d   : > { %1168 = vmatpush.bf16.msra.mxu0 %v918_v22  ;;  %1181 = vmatpush.bf16.msra.mxu1 %v919_v23 }
 0x28f   : > { %1510 = vmatmul.msk.bf16.vlgmr.msrb.gmra.mxu2 %vm863_vm3, %v1509_v32  ;;  %1511 = vmatmul.msk.bf16.vlgmr.msrb.gmra.mxu3 %vm863_vm3, %v1509_v32 }
 0x290   : > { %1209 = vmatpush.bf16.msrb.mxu2 %v918_v22  ;;  %1222 = vmatpush.bf16.msrb.mxu3 %v919_v23 }
 0x291   : > { %1169 = vmatpush.bf16.msra.mxu0 %v916_v27  ;;  %1182 = vmatpush.bf16.msra.mxu1 %v917_v28 }
 0x294   : > { %1210 = vmatpush.bf16.msrb.mxu2 %v916_v27  ;;  %1223 = vmatpush.bf16.msrb.mxu3 %v917_v28 }
 0x29c   : > { %1513 = vmatmul.msk.bf16.vlgmr.msrb.gmra.mxu0 %vm863_vm3, %v1512_v33  ;;  %1514 = vmatmul.msk.bf16.vlgmr.msrb.gmra.mxu1 %vm863_vm3, %v1512_v33 }
 0x29d   : > { %1250 = vmatpush.bf16.msrb.mxu0 %v918_v22  ;;  %1263 = vmatpush.bf16.msrb.mxu1 %v919_v23 }
 0x29f   : > { %1516 = vmatmul.msk.bf16.vlgmr.msra.gmra.mxu2 %vm863_vm3, %v1515_v34  ;;  %1517 = vmatmul.msk.bf16.vlgmr.msra.gmra.mxu3 %vm863_vm3, %v1515_v34 }
 0x2a1   : > { %1251 = vmatpush.bf16.msrb.mxu0 %v916_v27  ;;  %1264 = vmatpush.bf16.msrb.mxu1 %v917_v28 }
 0x2ac   : > { %1519 = vmatmul.msk.bf16.vlgmr.msra.gmra.mxu0 %vm863_vm3, %v1518_v36  ;;  %1520 = vmatmul.msk.bf16.vlgmr.msra.gmra.mxu1 %vm863_vm3, %v1518_v36 }
 0x2af   : > { %1522 = vmatmul.msk.bf16.vlgmr.msrb.gmra.mxu2 %vm863_vm3, %v1521_v37  ;;  %1523 = vmatmul.msk.bf16.vlgmr.msrb.gmra.mxu3 %vm863_vm3, %v1521_v37 }
 0x2bc   : > { %1525 = vmatmul.msk.bf16.vlgmr.msrb.gmra.mxu0 %vm863_vm3, %v1524_v38  ;;  %1526 = vmatmul.msk.bf16.vlgmr.msrb.gmra.mxu1 %vm863_vm3, %v1524_v38 }
 0x2f9   : > { %v933_v41 = vpop.f32.mrf.mxu0  ;;  %v946_v42 = vpop.f32.mrf.mxu1 }
 0x2fa   : > { %952 = vrot.lane.b32.xlu0 %v946_v42, %s1624_s25  ;;  %950 = vrot.lane.b32.xlu2 %v933_v41, %s1624_s25 }
 0x301   : > { %v935_v46 = vpop.f32.mrf.mxu0  ;;  %v948_v47 = vpop.f32.mrf.mxu1 }
 0x302   : > { %v974_v43 = vpop.f32.mrf.mxu2  ;;  %v987_v45 = vpop.f32.mrf.mxu3 }
 0x303   : > { %991 = vrot.lane.b32.xlu1 %v974_v43, %s1625_s26  ;;  %993 = vrot.lane.b32.xlu2 %v987_v45, %s1625_s26 }
 0x309   : > { %v1015_v52 = vpop.f32.mrf.mxu0  ;;  %v1028_v53 = vpop.f32.mrf.mxu1 }
 0x30a   : > { %v976_v50 = vpop.f32.mrf.mxu2  ;;  %v989_v51 = vpop.f32.mrf.mxu3  ;;  %1032 = vrot.lane.b32.xlu0 %v1015_v52, %s1621_s20 }
 0x30b   : > { %1034 = vrot.lane.b32.xlu1 %v1028_v53, %s1621_s20 }
 0x311   : > { %v1017_v56 = vpop.f32.mrf.mxu0  ;;  %v1030_v57 = vpop.f32.mrf.mxu1 }
 0x312   : > { %v1056_v54 = vpop.f32.mrf.mxu2  ;;  %v1069_v55 = vpop.f32.mrf.mxu3 }
 0x313   : > { %1073 = vrot.lane.b32.xlu2 %v1056_v54, %s1623_s22  ;;  %1075 = vrot.lane.b32.xlu0 %v1069_v55, %s1623_s22 }
 0x319   : > { %v1979_v60 = vpop.f32.mrf.mxu0  ;;  %v1981_v61 = vpop.f32.mrf.mxu1 }
 0x31a   : > { %v1058_v58 = vpop.f32.mrf.mxu2  ;;  %v1071_v59 = vpop.f32.mrf.mxu3 }
 0x321   : > { %v1099_v63 = vpop.f32.mrf.mxu0  ;;  %v1112_v0 = vpop.f32.mrf.mxu1 }
 0x322   : > { %v1130_v62 = vpop.f32.mrf.mxu2  ;;  %v1143_v1 = vpop.f32.mrf.mxu3 }
 0x323   : > { %1147 = vrot.lane.b32.xlu1 %v1130_v62, %s1619_s16  ;;  %1149 = vrot.lane.b32.xlu2 %v1143_v1, %s1619_s16 }
 0x329   : > { %v1171_v17 = vpop.f32.mrf.mxu0  ;;  %v1184_v2 = vpop.f32.mrf.mxu1 }
 0x32a   : > { %v1132_v16 = vpop.f32.mrf.mxu2  ;;  %v1145_v3 = vpop.f32.mrf.mxu3  ;;  %1188 = vrot.lane.b32.xlu0 %v1171_v17, %s1622_s21 }
 0x32b   : > { %1190 = vrot.lane.b32.xlu1 %v1184_v2, %s1622_s21 }
 0x331   : > { %v1173_v5 = vpop.f32.mrf.mxu0  ;;  %v1186_v6 = vpop.f32.mrf.mxu1 }
 0x332   : > { %v1212_v4 = vpop.f32.mrf.mxu2  ;;  %v1225_v7 = vpop.f32.mrf.mxu3 }
 0x333   : > { %1229 = vrot.lane.b32.xlu2 %v1212_v4, %s1618_s15  ;;  %1231 = vrot.lane.b32.xlu0 %v1225_v7, %s1618_s15 }
 0x339   : > { %v1253_v10 = vpop.f32.mrf.mxu0  ;;  %v1266_v11 = vpop.f32.mrf.mxu1 }
 0x33a   : > { %v1214_v9 = vpop.f32.mrf.mxu2  ;;  %1270 = vrot.lane.b32.xlu1 %v1253_v10, %s1620_s19  ;;  %v1227_v12 = vpop.f32.mrf.mxu3 }
 0x33b   : > { %1272 = vrot.lane.b32.xlu2 %v1266_v11, %s1620_s19  ;;  %1283 = vperm.xlu0 %1554, %v1280_v8  }
 0x341   : > { %v1255_v13 = vpop.f32.mrf.mxu0  ;;  %v1268_v18 = vpop.f32.mrf.mxu1 }
 0x354   : > { %v951_v19 = vpop.permute.xlu2 %950 }
 0x35d   : > { %v994_v21 = vpop.permute.xlu2 %993 }
 0x36c   : > { %v953_v20 = vpop.permute.xlu0 %952 }
 0x36d   : > { %v1074_v24 = vpop.permute.xlu2 %1073  ;;  %v954_v31 = vsel %vm566_vm11, %v951_v19, %v953_v20  ;;  %v955_v32 = vsel %vm566_vm11, %v953_v20, %v951_v19  ;;  %vm2117_vm11 = vcmp.lt.s32.totalorder %v1751_v25, 111 }
 0x36e   : > { %v956_v43 = vsel %vm481_vm2, %v955_v32, 0.0  ;;  %v957_v45 = vsel %vm1786_vm14, %v954_v31, 0.0  ;;  %vm2112_vm2 = vcmp.lt.s32.totalorder %v1751_v25, 113 }
 0x375   : > { %v992_v22 = vpop.permute.xlu1 %991 }
 0x376   : > { %v996_v29 = vsel %vm579_vm13, %v994_v21, %v992_v22  ;;  %v995_v36 = vsel %vm579_vm13, %v992_v22, %v994_v21 }
 0x377   : > { %v997_v37 = vsel %vm1766_vm7, %v996_v29, 0.0  ;;  %v1000_v51 = vadd.f32 %v995_v36, %v957_v45  ;;  %vm2114_vm7 = vcmp.lt.s32.totalorder %v1751_v25, 112 }
 0x378   : > { %v999_v50 = vadd.f32 %v997_v37, %v956_v43 }
 0x37c   : > { %v1033_v23 = vpop.permute.xlu0 %1032 }
 0x37d   : > { %v1035_v26 = vpop.permute.xlu1 %1034  ;;  %v1150_v28 = vpop.permute.xlu2 %1149 }
 0x37e   : > { %v1036_v33 = vsel %vm592_vm4, %v1033_v23, %v1035_v26  ;;  %v1037_v34 = vsel %vm592_vm4, %v1035_v26, %v1033_v23  ;;  %vm2113_vm4 = vmmov %vm2112_vm2 }
 0x37f   : > { %v1038_v46 = vsel %vm483_vm15, %v1037_v34, 0.0  ;;  %v1039_v47 = vsel %vm1771_vm9, %v1036_v33, 0.0 }
 0x380   : > { %v1040_v55 = vadd.f32 %v1038_v46, %v999_v50  ;;  %v1041_v56 = vadd.f32 %v1039_v47, %v1000_v51 }
 0x385   : > { %v1076_v27 = vpop.permute.xlu0 %1075 }
 0x386   : > { %v1077_v41 = vsel %vm605_vm8, %v1074_v24, %v1076_v27  ;;  %v1078_v42 = vsel %vm605_vm8, %v1076_v27, %v1074_v24  ;;  %vm2115_vm8 = vmand %vm1758_vm5, %vm1786_vm14 }
 0x387   : > { %v1079_v52 = vsel %vm1782_vm12, %v1078_v42, 0.0  ;;  %v1080_v53 = vsel %vm1786_vm14, %v1077_v41, 0.0  ;;  %vm2119_vm14 = vmand %vm1758_vm5, %vm1771_vm9 }
 0x388   : > { %v1081_v40 = vadd.f32 %v1079_v52, %v1040_v55  ;;  %v1082_v58 = vadd.f32 %v1080_v53, %v1041_v56 }
 0x38a   : > { %v1114_v2 = vadd.f32 %v1979_v60, %v1081_v40  ;;  %v1115_v3 = vadd.f32 %v1981_v61, %v1082_v58 }
 0x38d   : > { %v1230_v54 = vpop.permute.xlu2 %1229 }
 0x395   : > { %v1148_v30 = vpop.permute.xlu1 %1147  ;;  %v1273_v61 = vpop.permute.xlu2 %1272 }
 0x396   : > { %v1151_v59 = vsel %vm618_vm10, %v1148_v30, %v1150_v28  ;;  %v1152_v62 = vsel %vm618_vm10, %v1150_v28, %v1148_v30  ;;  %vm2116_vm10 = vmmov %vm2114_vm7 }
 0x397   : > { %v1153_v16 = vsel %vm1762_vm6, %v1151_v59, 0.0  ;;  %v1154_v17 = vsel %vm1771_vm9, %v1152_v62, 0.0 }
 0x398   : > { %v1155_v7 = vadd.f32 %v1153_v16, %v1114_v2  ;;  %v1156_v8 = vadd.f32 %v1154_v17, %v1115_v3 }
 0x39c   : > { %v1189_v38 = vpop.permute.xlu0 %1188 }
 0x39d   : > { %v1191_v57 = vpop.permute.xlu1 %1190 }
 0x39e   : > { %v1192_v63 = vsel %vm2112_vm2, %v1189_v38, %v1191_v57  ;;  %v1193_v0 = vsel %vm2113_vm4, %v1191_v57, %v1189_v38  ;;  %vm2120_vm4 = vcmask 1041408  }
 0x39f   : > { %v1194_v5 = vsel %vm1782_vm12, %v1192_v63, 0.0  ;;  %v1195_v6 = vsel %vm2115_vm8, %v1193_v0, 0.0  ;;  %vm2118_vm12 = vmmov %vm2117_vm11 }
 0x3a0   : > { %v1196_v10 = vadd.f32 %v1194_v5, %v1155_v7  ;;  %v1197_v11 = vadd.f32 %v1195_v6, %v1156_v8 }
 0x3a5   : > { %v1232_v1 = vpop.permute.xlu0 %1231 }
 0x3a6   : > { %v1234_v4 = vsel %vm2114_vm7, %v1232_v1, %v1230_v54  ;;  %v1233_v9 = vsel %vm2116_vm10, %v1230_v54, %v1232_v1  ;;  %vm2121_vm7 = vmmov %vm2120_vm4 }
 0x3a7   : > { %v1236_v60 = vsel %vm1758_vm5, %v1234_v4, 0.0  ;;  %v1237_v48 = vadd.f32 %v1233_v9, %v1196_v10 }
 0x3a8   : > { %v1238_v13 = vadd.f32 %v1236_v60, %v1197_v11 }
 0x3ac   : > { %v1271_v12 = vpop.permute.xlu1 %1270 }
 0x3ad   : > { %v1274_v18 = vsel %vm2117_vm11, %v1271_v12, %v1273_v61  ;;  %v1275_v49 = vsel %vm2118_vm12, %v1273_v61, %v1271_v12  ;;  %v1284_v23 = vpop.permute.xlu0 %1283 }
 0x3ae   : > { %v1276_v19 = vsel %vm1762_vm6, %v1274_v18, 0.0  ;;  %v1277_v20 = vsel %vm2119_vm14, %v1275_v49, 0.0 }
 0x3af   : > { %v1278_v21 = vadd.f32 %v1276_v19, %v1237_v48  ;;  %v1279_v22 = vadd.f32 %v1277_v20, %v1238_v13 }
 0x3b1   : > { %v1286_v24 = vadd.f32 %v1284_v23, %v1278_v21  ;;  %v1287_v26 = vadd.f32 %v1284_v23, %v1279_v22 }
 0x3b3   : > { %v1288_v27 = vadd.f32 2.0, %v1286_v24  ;;  %v1289_v28 = vadd.f32 2.0, %v1287_v26  ;;  %v1329_v57 = vadd.f32 %v1287_v26, %v1713_v15  ;;  %v1328_v59 = vadd.f32 %v1286_v24, %v1711_v14 }
 0x3b5   : > { %v1527_v29 = vmul.f32 -1.442695, %v1288_v27  ;;  %v1528_v30 = vmul.f32 -1.442695, %v1289_v28 }
 0x3b7   : > { %1597 = vpow2.f32 %v1527_v29 }
 0x3b8   : > { %1599 = vpow2.f32 %v1528_v30 }
 0x3bd   : > { %v1598_v25 = vpop.eup %1597 }
 0x3be   : > { %v1600_v39 = vpop.eup %1599  ;;  %v1296_v31 = vadd.f32 1.0, %v1598_v25 }
 0x3bf   : > { %v1297_v32 = vadd.f32 1.0, %v1600_v39 }
 0x3c0   : > { %1601 = vrcp.f32 %v1296_v31  ;;  %v1309_v37 = vand.u32 2147483648, %v1296_v31  ;;  %v1307_v42 = vand.u32 2147483647, %v1296_v31  ;;  %vm1303_vm9 = vweird.f32 %v1296_v31 }
 0x3c1   : > { %1603 = vrcp.f32 %v1297_v32  ;;  %v1324_v43 = vand.u32 2147483648, %v1297_v32  ;;  %v1322_v46 = vand.u32 2147483647, %v1297_v32  ;;  %vm1318_vm1 = vweird.f32 %v1297_v32 }
 0x3c2   : > { %v1310_v50 = vor.u32 1.1754944e-38, %v1309_v37  ;;  %vm1308_vm13 = vcmp.eq.f32.partialorder %v1307_v42, 8.507059e+37 }
 0x3c3   : > { %v1325_v53 = vor.u32 1.1754944e-38, %v1324_v43  ;;  %vm1323_vm2 = vcmp.eq.f32.partialorder %v1322_v46, 8.507059e+37 }
 0x3c6   : > { %v1602_v35 = vpop.eup %1601 }
 0x3c7   : > { %v1604_v44 = vpop.eup %1603  ;;  %v1299_v33 = vmul.f32 %v1602_v35, %v1296_v31  ;;  %vm1304_vm5 = vweird.f32 %v1602_v35 }
 0x3c8   : > { %v1314_v34 = vmul.f32 %v1604_v44, %v1297_v32  ;;  %vm1319_vm6 = vweird.f32 %v1604_v44  ;;  %vm1305_vm15 = vmor %vm1303_vm9, %vm1304_vm5 }
 0x3c9   : > { %v1300_v36 = vsub.f32 1.0, %v1299_v33  ;;  %vm1320_vm3 = vmor %vm1318_vm1, %vm1319_vm6 }
 0x3ca   : > { %v1315_v38 = vsub.f32 1.0, %v1314_v34 }
 0x3cb   : > { %v1301_v41 = vmul.f32 %v1602_v35, %v1300_v36 }
 0x3cc   : > { %v1316_v45 = vmul.f32 %v1604_v44, %v1315_v38 }
 0x3cd   : > { %v1302_v47 = vadd.f32 %v1602_v35, %v1301_v41 }
 0x3ce   : > { %v1317_v51 = vadd.f32 %v1604_v44, %v1316_v45 }
 0x3cf   : > { %v1306_v52 = vsel %vm1305_vm15, %v1602_v35, %v1302_v47 }
 0x3d0   : > { %v1311_v54 = vsel %vm1308_vm13, %v1310_v50, %v1306_v52  ;;  %v1321_v55 = vsel %vm1320_vm3, %v1604_v44, %v1317_v51 }
 0x3d1   : > { %v1326_v56 = vsel %vm1323_vm2, %v1325_v53, %v1321_v55  ;;  %1605 = vlog2.f32 %v1311_v54  ;;  %v1332_v58 = vrot.slane %v1311_v54, 6 }
 0x3d2   : > { %v1333_v40 = vrot.slane %v1326_v56, 6  ;;  %1607 = vlog2.f32 %v1326_v56 }
 0x3d3   : > { %v1336_v0 = vmul.f32 %v1332_v58, %v1328_v59 }
 0x3d4   : > { %v1337_v62 = vmul.f32 %v1333_v40, %v1329_v57 }
 0x3d6   : > { %v1346_v63 = vrot.slane %v1337_v62, 4 }
 0x3d7   : > { %v1606_v1 = vpop.eup %1605 }
 0x3d8   : > { %v1608_v16 = vpop.eup %1607  ;;  %v1351_v17 = vmul.f32 0.6931472, %v1606_v1  ;;  %v1347_v2 = vsel %vm505_vm0, %v1336_v0, %v1346_v63  ;;  %vm1367_vm0 = vcmask 0  }
 0x3d9   : > { %v1353_v3 = vmul.f32 0.6931472, %v1608_v16  ;;  %1349 = vst [vmem:[%s1718_s14] sm:$0xcc] %v1347_v2  ;;  %s420_s14 = scalar_lea.vmem %s2093_s11, %s2125_s18 }
 0x3da   : > { %v1354_v4 = vsel %vm2120_vm4, %v1351_v17, 0.0 }
 0x3db   : > { %v1355_v15 = vsel %vm2121_vm7, %v1353_v3, 0.0 }
 0x3dc   : > { %v1356_v5 = vadd.f32 %v1355_v15, %v1354_v4 }
 0x3de   : > { %1357 = vadd.xlane.f32.xlu1 %v1356_v5 }
 0x451   : > { %v1358_v6 = vpop.xlane.xlu1 %1357 }
 0x452   : > { %v1359_v14 = vrot.slane %v1358_v6, 4 }
 0x454   : > { %v1360_v7 = vadd.f32 %v1359_v14, %v1358_v6 }
 0x456   : > { %v1361_v8 = vrot.slane %v1360_v7, 2 }
 0x458   : > { %v1362_v9 = vadd.f32 %v1361_v8, %v1360_v7 }
 0x45a   : > { %v1363_v60 = vrot.slane %v1362_v9, 1 }
 0x45c   : > { %v1364_v61 = vadd.f32 %v1363_v60, %v1362_v9 }
 0x45e   : > { %1535 = vpush %v1364_v61 }
 0x48f   : > { %s1536_s19 = spop %1535 }
 0x490   : > { %v1366_v10 = vstv %s1536_s19 }
 0x491   : > { %1368 = vst.msk [vmem:[%s420_s14] sm:$0x1] %vm1367_vm0, %v1366_v10 }
 0x492 PF: > { %s22_s17 = sadd.s32 1, %s1615_s17  }
 0x493   : > { %p19_p5 = scmp.ge.s32.totalorder %s22_s17, 4  }
 0x495   :  { %21 = sbr.rel (!%p19_p5) target bundleno = 1 (0x1), region = 113 }

</bundles_post_ra>
